<compile_context>
chip_gen: v5e
topology: v5e:2x2
jax: 0.10.0
libtpu: 0.0.40
codegen_flags: <defaults>
</compile_context>

<pallas_src>
import jax
import jax.numpy as jnp
from jax import lax
from jax.experimental import pallas as pl
from jax.experimental.pallas import tpu as pltpu


def _round_up(x, m):
    return (x + m - 1) // m * m


_VMEM_LIMIT = 32 * 1024 * 1024


# -----------------------------------------------------------------------------
# Bidirectional LSTM kernel (forward + reverse in one pass, packed semantics).
#   x_ref:     [T, NB, E]   time-major input tile (f32)
#   len_ref:   [NB, 1]      int32 valid lengths
#   wih_*_ref: [E, 4H]      W_ih^T (bf16)
#   whh_*_ref: [H, 4H]      W_hh^T (bf16)
#   b_*_ref:   [1, 4H]      b_ih + b_hh (f32)
#   out_f_ref: [T, NB, H]   forward hidden states (zero past length)
#   out_r_ref: [T, NB, H]   reverse hidden states (zero past length)
#   xg_*_ref:  [T, NB, 4H]  scratch: precomputed input projections
# PyTorch gate order: i, f, g, o.
# -----------------------------------------------------------------------------
def bilstm_kernel(x_ref, len_ref,
                  wih_f_ref, whh_f_ref, b_f_ref,
                  wih_r_ref, whh_r_ref, b_r_ref,
                  out_f_ref, out_r_ref,
                  xg_f_ref, xg_r_ref):
    T, NB, E = x_ref.shape
    H = whh_f_ref.shape[0]
    G = 4 * H

    # ---- Pre-pass: hoisted input projection, one big bf16 MXU matmul per dir.
    x_all = x_ref[...].reshape(T * NB, E).astype(jnp.bfloat16)      # [T*NB, E]
    xg_f_ref[...] = (
        jnp.dot(x_all, wih_f_ref[...], preferred_element_type=jnp.float32)
        + b_f_ref[...]
    ).reshape(T, NB, G)
    xg_r_ref[...] = (
        jnp.dot(x_all, wih_r_ref[...], preferred_element_type=jnp.float32)
        + b_r_ref[...]
    ).reshape(T, NB, G)

    lens = len_ref[...]                                             # [NB, 1] int32

    def gates_to_hc(gates, c_prev):
        i_g = jax.nn.sigmoid(gates[:, 0:H])
        f_g = jax.nn.sigmoid(gates[:, H:2 * H])
        g_g = jnp.tanh(gates[:, 2 * H:3 * H])
        o_g = jax.nn.sigmoid(gates[:, 3 * H:4 * H])
        c_new = f_g * c_prev + i_g * g_g
        h_new = o_g * jnp.tanh(c_new)
        return h_new, c_new

    def step(s, carry):
        h_f, c_f, h_r, c_r = carry

        # ---- forward direction at t = s
        t_f = s
        g_f = xg_f_ref[t_f] + jnp.dot(
            h_f.astype(jnp.bfloat16), whh_f_ref[...],
            preferred_element_type=jnp.float32)
        h_fn, c_fn = gates_to_hc(g_f, c_f)
        valid_f = (t_f < lens).astype(jnp.float32)                  # [NB, 1]
        h_f = valid_f * h_fn + (1.0 - valid_f) * h_f
        c_f = valid_f * c_fn + (1.0 - valid_f) * c_f
        out_f_ref[t_f] = valid_f * h_fn

        # ---- reverse direction at t = T-1-s (packed reverse semantics:
        # state stays zero until t == len-1, then runs down to t = 0).
        t_r = T - 1 - s
        g_r = xg_r_ref[t_r] + jnp.dot(
            h_r.astype(jnp.bfloat16), whh_r_ref[...],
            preferred_element_type=jnp.float32)
        h_rn, c_rn = gates_to_hc(g_r, c_r)
        valid_r = (t_r < lens).astype(jnp.float32)
        h_r = valid_r * h_rn + (1.0 - valid_r) * h_r
        c_r = valid_r * c_rn + (1.0 - valid_r) * c_r
        out_r_ref[t_r] = valid_r * h_rn

        return (h_f, c_f, h_r, c_r)

    z = jnp.zeros((NB, H), jnp.float32)
    lax.fori_loop(0, T, step, (z, z, z, z))


def bilstm_all(x, lens, p_lstm):
    """x: [N, T, E] f32, lens: [N] int32 -> [N, T, 2H] f32 (qa + docs batched)."""
    N, T, E = x.shape
    H = p_lstm["whh_f"].shape[0]
    G = 4 * H

    NB = min(_round_up(max(N, 1), 8), 64)
    N_pad = _round_up(N, NB)
    if N_pad != N:
        x = jnp.pad(x, ((0, N_pad - N), (0, 0), (0, 0)))
        lens = jnp.pad(lens, (0, N_pad - N))

    x_tm = jnp.transpose(x, (1, 0, 2)).astype(jnp.float32)          # [T, N_pad, E]
    lens2 = lens.reshape(N_pad, 1).astype(jnp.int32)

    bf = lambda a: a.astype(jnp.bfloat16)
    out_f, out_r = pl.pallas_call(
        bilstm_kernel,
        out_shape=(jax.ShapeDtypeStruct((T, N_pad, H), jnp.float32),
                   jax.ShapeDtypeStruct((T, N_pad, H), jnp.float32)),
        grid=(N_pad // NB,),
        in_specs=[
            pl.BlockSpec((T, NB, E), lambda i: (0, i, 0)),
            pl.BlockSpec((NB, 1), lambda i: (i, 0)),
            pl.BlockSpec((E, G), lambda i: (0, 0)),
            pl.BlockSpec((H, G), lambda i: (0, 0)),
            pl.BlockSpec((1, G), lambda i: (0, 0)),
            pl.BlockSpec((E, G), lambda i: (0, 0)),
            pl.BlockSpec((H, G), lambda i: (0, 0)),
            pl.BlockSpec((1, G), lambda i: (0, 0)),
        ],
        out_specs=(pl.BlockSpec((T, NB, H), lambda i: (0, i, 0)),
                   pl.BlockSpec((T, NB, H), lambda i: (0, i, 0))),
        scratch_shapes=[pltpu.VMEM((T, NB, G), jnp.float32),
                        pltpu.VMEM((T, NB, G), jnp.float32)],
        compiler_params=pltpu.CompilerParams(
            dimension_semantics=("parallel",),
            vmem_limit_bytes=_VMEM_LIMIT),
    )(x_tm, lens2,
      bf(p_lstm["wih_f"]), bf(p_lstm["whh_f"]), p_lstm["b_f"],
      bf(p_lstm["wih_r"]), bf(p_lstm["whh_r"]), p_lstm["b_r"])

    out = jnp.concatenate([out_f, out_r], axis=-1)                  # [T, N_pad, 2H]
    out = jnp.transpose(out, (1, 0, 2))                             # [N_pad, T, 2H]
    return out[:N]


# -----------------------------------------------------------------------------
# Fused attention + fusion-layer kernel.
#   q_ref:   [1, TLq, D]   query tile (f32)       kv_ref: [1, Lk, D] keys==values
#   qv_ref:  [1, TLq, 1]   query validity (0/1)   kvm_ref: [1, 1, Lk] key validity
#   w_ref:   [4D, D]       fusion W^T (bf16)      b_ref:   [1, D]    fusion bias
#   o_ref:   [1, TLq, D]   tanh(cat[q, att, q*att, q-att] @ W + b)
# -----------------------------------------------------------------------------
def attn_fusion_kernel(q_ref, kv_ref, qv_ref, kvm_ref, w_ref, b_ref, o_ref):
    q = q_ref[0]                                                    # [TLq, D] f32
    kv = kv_ref[0]                                                  # [Lk, D]  f32
    qvalid = qv_ref[0]                                              # [TLq, 1]
    kvalid = kvm_ref[0]                                             # [1, Lk]
    D = q.shape[-1]
    scale = 1.0 / float(D) ** 0.5

    q_bf = q.astype(jnp.bfloat16)
    kv_bf = kv.astype(jnp.bfloat16)

    # scores = q @ kv^T / sqrt(D)    (bf16 operands, f32 accumulation)
    scores = lax.dot_general(q_bf, kv_bf, (((1,), (1,)), ((), ())),
                             preferred_element_type=jnp.float32)    # [TLq, Lk]
    scores = scores * scale
    mask = qvalid * kvalid                                          # [TLq, Lk]
    scores = jnp.where(mask > 0.0, scores, -1e9)

    # f32 softmax (max-subtracted), EUP reciprocal
    scores = scores - jnp.max(scores, axis=-1, keepdims=True)
    p = jnp.exp(scores)
    p = p * pl.reciprocal(jnp.sum(p, axis=-1, keepdims=True), approx=True)

    att = jnp.dot(p.astype(jnp.bfloat16), kv_bf,
                  preferred_element_type=jnp.float32)               # [TLq, D]

    # Fusion epilogue: Tanh(Linear_{4D->D}(cat[q, att, q*att, q-att])),
    # concat folded into 4 matmuls against static row-slices of W^T.
    w = w_ref[...]                                                  # [4D, D] bf16
    att_bf = att.astype(jnp.bfloat16)
    acc = jnp.dot(q_bf, w[0:D], preferred_element_type=jnp.float32)
    acc = acc + jnp.dot(att_bf, w[D:2 * D], preferred_element_type=jnp.float32)
    acc = acc + jnp.dot((q * att).astype(jnp.bfloat16), w[2 * D:3 * D],
                        preferred_element_type=jnp.float32)
    acc = acc + jnp.dot((q - att).astype(jnp.bfloat16), w[3 * D:4 * D],
                        preferred_element_type=jnp.float32)
    o_ref[0] = jnp.tanh(acc + b_ref[...])


def attention_fusion(q, kv, q_valid, kv_valid, w_t_bf16, bias):
    """q: [B, Lq, D], kv: [B, Lk, D], q_valid: [B, Lq], kv_valid: [B, Lk]."""
    B, Lq, D = q.shape
    Lk = kv.shape[1]

    TLq = min(_round_up(Lq, 8), 256)
    Lq_pad = _round_up(Lq, TLq)
    if Lq_pad != Lq:
        q = jnp.pad(q, ((0, 0), (0, Lq_pad - Lq), (0, 0)))
        q_valid = jnp.pad(q_valid, ((0, 0), (0, Lq_pad - Lq)))

    qv = q_valid.astype(jnp.float32)[:, :, None]                    # [B, Lq_pad, 1]
    kvv = kv_valid.astype(jnp.float32)[:, None, :]                  # [B, 1, Lk]

    out = pl.pallas_call(
        attn_fusion_kernel,
        out_shape=jax.ShapeDtypeStruct((B, Lq_pad, D), jnp.float32),
        grid=(B, Lq_pad // TLq),
        in_specs=[
            pl.BlockSpec((1, TLq, D), lambda b, i: (b, i, 0)),
            pl.BlockSpec((1, Lk, D), lambda b, i: (b, 0, 0)),
            pl.BlockSpec((1, TLq, 1), lambda b, i: (b, i, 0)),
            pl.BlockSpec((1, 1, Lk), lambda b, i: (b, 0, 0)),
            pl.BlockSpec((4 * D, D), lambda b, i: (0, 0)),
            pl.BlockSpec((1, D), lambda b, i: (0, 0)),
        ],
        out_specs=pl.BlockSpec((1, TLq, D), lambda b, i: (b, i, 0)),
        compiler_params=pltpu.CompilerParams(
            dimension_semantics=("parallel", "parallel"),
            vmem_limit_bytes=_VMEM_LIMIT),
    )(q, kv, qv, kvv, w_t_bf16, bias)
    return out[:, :Lq, :]


# -----------------------------------------------------------------------------
# Encoder forward (glue in plain JAX: reshapes, validity vectors).
# -----------------------------------------------------------------------------
@jax.jit
def encoder_forward(qa, qa_len, docs, doc_lens, params):
    B, T, E = qa.shape
    S = docs.shape[1]
    H = params["lstm"]["whh_f"].shape[0]
    D = 2 * H

    docs_flat = docs.reshape(B * S, T, E)
    doc_lens_flat = doc_lens.reshape(B * S)

    # One BiLSTM call for qa + all docs (shared weights).
    x_all = jnp.concatenate([qa, docs_flat], axis=0)                # [B + B*S, T, E]
    lens_all = jnp.concatenate([qa_len.reshape(-1), doc_lens_flat], axis=0)
    lstm_out = bilstm_all(x_all, lens_all, params["lstm"])          # [B + B*S, T, 2H]

    qa_lstm = lstm_out[:B]                                          # [B, T, D]
    doc_lstm = lstm_out[B:].reshape(B, S * T, D)                    # [B, S*T, D]

    # Per-position validity vectors (tiny) instead of a [B, S*T, T] mask.
    qa_valid = (jnp.arange(T)[None, :] < qa_len.reshape(B, 1)).astype(jnp.float32)
    doc_valid = (jnp.arange(T)[None, :] < doc_lens_flat[:, None]).astype(jnp.float32)
    doc_valid = doc_valid.reshape(B, S * T)

    w_t = params["fusion_wT"].astype(jnp.bfloat16)                  # [4D, D]
    bias = params["fusion_b"]                                       # [1, D]

    doc_encode = attention_fusion(doc_lstm, qa_lstm, doc_valid, qa_valid, w_t, bias)
    qa_encode = attention_fusion(qa_lstm, doc_lstm, qa_valid, doc_valid, w_t, bias)

    return (doc_encode.reshape(B, S, T, D), qa_encode, qa_lstm,
            doc_lstm.reshape(B, S, T, D))


# -----------------------------------------------------------------------------
# Pure-JAX reference (f32, reverse-by-length path) to validate the kernels.
# -----------------------------------------------------------------------------
def _lstm_scan_ref(x, lens, w_ihT, w_hhT, b):
    N, T, E = x.shape
    H = w_hhT.shape[0]

    def step(carry, t):
        h, c = carry
        x_t = x[:, t, :]
        g = x_t @ w_ihT + h @ w_hhT + b
        i = jax.nn.sigmoid(g[:, :H])
        f = jax.nn.sigmoid(g[:, H:2 * H])
        gg = jnp.tanh(g[:, 2 * H:3 * H])
        o = jax.nn.sigmoid(g[:, 3 * H:])
        c_new = f * c + i * gg
        h_new = o * jnp.tanh(c_new)
        valid = (t < lens)[:, None].astype(jnp.float32)
        h = valid * h_new + (1 - valid) * h
        c = valid * c_new + (1 - valid) * c
        return (h, c), valid * h_new

    z = jnp.zeros((N, H), jnp.float32)
    _, outs = lax.scan(step, (z, z), jnp.arange(T))
    return jnp.transpose(outs, (1, 0, 2))                           # [N, T, H]


def _reverse_by_length(x, lens, T):
    t = jnp.arange(T)
    idx = lens[:, None] - 1 - t[None, :]
    valid = idx >= 0
    idx = jnp.clip(idx, 0, T - 1)
    g = jnp.take_along_axis(x, idx[:, :, None], axis=1)
    return jnp.where(valid[:, :, None], g, 0.0)


def encoder_reference(qa, qa_len, docs, doc_lens, params):
    B, T, E = qa.shape
    S = docs.shape[1]
    p = params["lstm"]
    H = p["whh_f"].shape[0]
    D = 2 * H

    def bilstm_ref(x, lens):
        of = _lstm_scan_ref(x, lens, p["wih_f"], p["whh_f"], p["b_f"])
        x_rev = _reverse_by_length(x, lens, T)
        orr = _lstm_scan_ref(x_rev, lens, p["wih_r"], p["whh_r"], p["b_r"])
        orv = _reverse_by_length(orr, lens, T)
        return jnp.concatenate([of, orv], axis=-1)

    qa_lstm = bilstm_ref(qa, qa_len.reshape(-1))
    docs_flat = docs.reshape(B * S, T, E)
    doc_lens_flat = doc_lens.reshape(-1)
    doc_lstm = bilstm_ref(docs_flat, doc_lens_flat).reshape(B, S * T, D)

    qa_valid = (jnp.arange(T)[None, :] < qa_len.reshape(B, 1)).astype(jnp.float32)
    doc_valid = (jnp.arange(T)[None, :] < doc_lens_flat[:, None]).astype(jnp.float32)
    doc_valid = doc_valid.reshape(B, S * T)

    def attn_fusion_ref(q, kv, qv, kvv):
        scores = jnp.einsum("bqd,bkd->bqk", q, kv) / jnp.sqrt(jnp.float32(D))
        mask = qv[:, :, None] * kvv[:, None, :]
        scores = jnp.where(mask > 0, scores, -1e9)
        pr = jax.nn.softmax(scores, axis=-1)
        att = jnp.einsum("bqk,bkd->bqd", pr, kv)
        cat = jnp.concatenate([q, att, q * att, q - att], axis=-1)
        return jnp.tanh(cat @ params["fusion_wT"] + params["fusion_b"])

    doc_encode = attn_fusion_ref(doc_lstm, qa_lstm, doc_valid, qa_valid)
    qa_encode = attn_fusion_ref(qa_lstm, doc_lstm, qa_valid, doc_valid)
    return (doc_encode.reshape(B, S, T, D), qa_encode, qa_lstm,
            doc_lstm.reshape(B, S, T, D))


# -----------------------------------------------------------------------------
# Deterministic parameter initialization (shapes from the module __init__).
# -----------------------------------------------------------------------------
def init_params(key, embedding_size, hidden_size):
    E, H = embedding_size, hidden_size
    ks = jax.random.split(key, 6)

    def lstm_dir(k_ih, k_hh):
        w_ih = jax.random.normal(k_ih, (4 * H, E), jnp.float32) * jnp.sqrt(2.0 / E)
        w_hh = jax.random.normal(k_hh, (4 * H, H), jnp.float32) * 0.1
        # bias_ih = 0, bias_hh = 0 except forget-gate chunk set to 1.
        b = jnp.zeros((4 * H,), jnp.float32).at[H:2 * H].set(1.0)
        return w_ih.T, w_hh.T, b.reshape(1, 4 * H)

    wih_f, whh_f, b_f = lstm_dir(ks[0], ks[1])
    wih_r, whh_r, b_r = lstm_dir(ks[2], ks[3])

    D = 2 * H
    fusion_w = jax.random.normal(ks[4], (D, 4 * D), jnp.float32) * jnp.sqrt(1.0 / (4 * D))
    fusion_b = jax.random.normal(ks[5], (D,), jnp.float32) * 0.01

    return {
        "lstm": {"wih_f": wih_f, "whh_f": whh_f, "b_f": b_f,
                 "wih_r": wih_r, "whh_r": whh_r, "b_r": b_r},
        "fusion_wT": fusion_w.T,                 # [4D, D] == [8H, 2H]
        "fusion_b": fusion_b.reshape(1, D),      # [1, 2H]
    }


if __name__ == "__main__":
    B, S, T, E, H = 2, 3, 8, 32, 32

    key = jax.random.PRNGKey(0)
    k_qa, k_docs, k_params = jax.random.split(key, 3)
    qa = jax.random.normal(k_qa, (B, T, E), jnp.float32)
    docs = jax.random.normal(k_docs, (B, S, T, E), jnp.float32)
    qa_len = jnp.array([8, 5], jnp.int32)
    doc_lens = jnp.array([[8, 6, 3], [7, 8, 4]], jnp.int32)

    params = init_params(k_params, E, H)

    outs = encoder_forward(qa, qa_len, docs, doc_lens, params)
    jax.block_until_ready(outs)
    doc_encode, qa_encode, qa_lstm_o, doc_lstm_o = outs

    assert doc_encode.shape == (B, S, T, 2 * H)
    assert qa_encode.shape == (B, T, 2 * H)
    assert qa_lstm_o.shape == (B, T, 2 * H)
    assert doc_lstm_o.shape == (B, S, T, 2 * H)

    # Validate against a pure-JAX f32 reference (loose tol: bf16 MXU + approx recip).
    refs = encoder_reference(qa, qa_len, docs, doc_lens, params)
    for got, ref in zip(outs, refs):
        assert bool(jnp.all(jnp.isfinite(got)))
        err = float(jnp.max(jnp.abs(got - ref)))
        assert err < 5e-2, f"max abs err {err}"

    print("KERNEL_OK")
</pallas_src>

<mosaic_0001>
module attributes {stable_mosaic.version = 11 : i64} {
  func.func @bilstm_kernel(%arg0: i32, %arg1: memref<8x8x32xf32, #tpu.memory_space<vmem>>, %arg2: memref<8x1xi32, #tpu.memory_space<vmem>>, %arg3: memref<32x128xbf16, #tpu.memory_space<vmem>>, %arg4: memref<32x128xbf16, #tpu.memory_space<vmem>>, %arg5: memref<1x128xf32, #tpu.memory_space<vmem>>, %arg6: memref<32x128xbf16, #tpu.memory_space<vmem>>, %arg7: memref<32x128xbf16, #tpu.memory_space<vmem>>, %arg8: memref<1x128xf32, #tpu.memory_space<vmem>>, %arg9: memref<8x8x32xf32, #tpu.memory_space<vmem>>, %arg10: memref<8x8x32xf32, #tpu.memory_space<vmem>>, %arg11: memref<8x8x128xf32, #tpu.memory_space<vmem>>, %arg12: memref<8x8x128xf32, #tpu.memory_space<vmem>>) attributes {dimension_semantics = [#tpu.dimension_semantics<parallel>], iteration_bounds = array<i64: 1>, scalar_prefetch = 0 : i64, scratch_operands = 2 : i64, tpu.core_type = #tpu.core_type<tc>, window_params = [{transform_indices = @transform_0, window_bounds = array<i64: 8, 8, 32>}, {transform_indices = @transform_1, window_bounds = array<i64: 8, 1>}, {pipeline_mode = #tpu.pipeline_mode<synchronous>, transform_indices = @transform_2, window_bounds = array<i64: 32, 128>}, {pipeline_mode = #tpu.pipeline_mode<synchronous>, transform_indices = @transform_3, window_bounds = array<i64: 32, 128>}, {pipeline_mode = #tpu.pipeline_mode<synchronous>, transform_indices = @transform_4, window_bounds = array<i64: 1, 128>}, {pipeline_mode = #tpu.pipeline_mode<synchronous>, transform_indices = @transform_5, window_bounds = array<i64: 32, 128>}, {pipeline_mode = #tpu.pipeline_mode<synchronous>, transform_indices = @transform_6, window_bounds = array<i64: 32, 128>}, {pipeline_mode = #tpu.pipeline_mode<synchronous>, transform_indices = @transform_7, window_bounds = array<i64: 1, 128>}, {transform_indices = @transform_8, window_bounds = array<i64: 8, 8, 32>}, {transform_indices = @transform_9, window_bounds = array<i64: 8, 8, 32>}]} {
    %c0 = arith.constant 0 : index
    %c0_0 = arith.constant 0 : index
    %c0_1 = arith.constant 0 : index
    %0 = vector.load %arg1[%c0, %c0_0, %c0_1] : memref<8x8x32xf32, #tpu.memory_space<vmem>>, vector<8x8x32xf32>
    %1 = vector.shape_cast %0 : vector<8x8x32xf32> to vector<64x32xf32>
    %2 = arith.truncf %1 : vector<64x32xf32> to vector<64x32xbf16>
    %c0_2 = arith.constant 0 : index
    %c0_3 = arith.constant 0 : index
    %3 = vector.load %arg3[%c0_2, %c0_3] : memref<32x128xbf16, #tpu.memory_space<vmem>>, vector<32x128xbf16>
    %cst = arith.constant dense<0.000000e+00> : vector<64x128xf32>
    %4 = tpu.matmul %2, %3, %cst {dimension_numbers = #tpu.dot_dimension_numbers<[1], [0], [0], [1], [0, 0, 1, 1], [], []>} : vector<64x32xbf16>, vector<32x128xbf16>, vector<64x128xf32> -> vector<64x128xf32>
    %c0_4 = arith.constant 0 : index
    %c0_5 = arith.constant 0 : index
    %5 = vector.load %arg5[%c0_4, %c0_5] : memref<1x128xf32, #tpu.memory_space<vmem>>, vector<1x128xf32>
    %6 = vector.broadcast %5 : vector<1x128xf32> to vector<64x128xf32>
    %7 = arith.addf %4, %6 : vector<64x128xf32>
    %8 = vector.shape_cast %7 : vector<64x128xf32> to vector<8x8x128xf32>
    %c0_6 = arith.constant 0 : index
    %c0_7 = arith.constant 0 : index
    %c0_8 = arith.constant 0 : index
    %9 = vector.load %arg11[%c0_6, %c0_7, %c0_8] : memref<8x8x128xf32, #tpu.memory_space<vmem>>, vector<8x8x128xf32>
    tpu.vector_store %arg11[%c0_6, %c0_7, %c0_8], %8 {strides = array<i32>} : memref<8x8x128xf32, #tpu.memory_space<vmem>>, vector<8x8x128xf32>,
    %c0_9 = arith.constant 0 : index
    %c0_10 = arith.constant 0 : index
    %10 = vector.load %arg6[%c0_9, %c0_10] : memref<32x128xbf16, #tpu.memory_space<vmem>>, vector<32x128xbf16>
    %cst_11 = arith.constant dense<0.000000e+00> : vector<64x128xf32>
    %11 = tpu.matmul %2, %10, %cst_11 {dimension_numbers = #tpu.dot_dimension_numbers<[1], [0], [0], [1], [0, 0, 1, 1], [], []>} : vector<64x32xbf16>, vector<32x128xbf16>, vector<64x128xf32> -> vector<64x128xf32>
    %c0_12 = arith.constant 0 : index
    %c0_13 = arith.constant 0 : index
    %12 = vector.load %arg8[%c0_12, %c0_13] : memref<1x128xf32, #tpu.memory_space<vmem>>, vector<1x128xf32>
    %13 = vector.broadcast %12 : vector<1x128xf32> to vector<64x128xf32>
    %14 = arith.addf %11, %13 : vector<64x128xf32>
    %15 = vector.shape_cast %14 : vector<64x128xf32> to vector<8x8x128xf32>
    %c0_14 = arith.constant 0 : index
    %c0_15 = arith.constant 0 : index
    %c0_16 = arith.constant 0 : index
    %16 = vector.load %arg12[%c0_14, %c0_15, %c0_16] : memref<8x8x128xf32, #tpu.memory_space<vmem>>, vector<8x8x128xf32>
    tpu.vector_store %arg12[%c0_14, %c0_15, %c0_16], %15 {strides = array<i32>} : memref<8x8x128xf32, #tpu.memory_space<vmem>>, vector<8x8x128xf32>,
    %c0_17 = arith.constant 0 : index
    %c0_18 = arith.constant 0 : index
    %17 = vector.load %arg2[%c0_17, %c0_18] : memref<8x1xi32, #tpu.memory_space<vmem>>, vector<8x1xi32>
    %cst_19 = arith.constant 0.000000e+00 : f32
    %18 = vector.broadcast %cst_19 : f32 to vector<8x32xf32>
    %c0_i32 = arith.constant 0 : i32
    %c8_i32 = arith.constant 8 : i32
    %19 = arith.addi %c0_i32, %c8_i32 : i32
    %c1_i32 = arith.constant 1 : i32
    %20:4 = scf.for %arg13 = %c0_i32 to %19 step %c1_i32 iter_args(%arg14 = %18, %arg15 = %18, %arg16 = %18, %arg17 = %18) -> (vector<8x32xf32>, vector<8x32xf32>, vector<8x32xf32>, vector<8x32xf32>)  : i32 {
      %21 = arith.index_cast %arg13 : i32 to index
      %c0_21 = arith.constant 0 : index
      %c0_22 = arith.constant 0 : index
      %22 = vector.load %arg11[%21, %c0_21, %c0_22] : memref<8x8x128xf32, #tpu.memory_space<vmem>>, vector<1x8x128xf32>
      %23 = vector.shape_cast %22 : vector<1x8x128xf32> to vector<8x128xf32>
      %24 = arith.truncf %arg14 : vector<8x32xf32> to vector<8x32xbf16>
      %c0_23 = arith.constant 0 : index
      %c0_24 = arith.constant 0 : index
      %25 = vector.load %arg4[%c0_23, %c0_24] : memref<32x128xbf16, #tpu.memory_space<vmem>>, vector<32x128xbf16>
      %cst_25 = arith.constant dense<0.000000e+00> : vector<8x128xf32>
      %26 = tpu.matmul %24, %25, %cst_25 {dimension_numbers = #tpu.dot_dimension_numbers<[1], [0], [0], [1], [0, 0, 1, 1], [], []>} : vector<8x32xbf16>, vector<32x128xbf16>, vector<8x128xf32> -> vector<8x128xf32>
      %27 = arith.addf %23, %26 : vector<8x128xf32>
      %28 = vector.extract_strided_slice %27 {offsets = [0, 0], sizes = [8, 32], strides = [1, 1]} : vector<8x128xf32> to vector<8x32xf32>
      %29 = arith.negf %28 : vector<8x32xf32>
      %30 = math.exp %29 : vector<8x32xf32>
      %cst_26 = arith.constant 1.000000e+00 : f32
      %31 = vector.broadcast %cst_26 : f32 to vector<8x32xf32>
      %32 = arith.addf %31, %30 : vector<8x32xf32>
      %33 = arith.divf %31, %32 : vector<8x32xf32>
      %34 = vector.extract_strided_slice %27 {offsets = [0, 32], sizes = [8, 32], strides = [1, 1]} : vector<8x128xf32> to vector<8x32xf32>
      %35 = arith.negf %34 : vector<8x32xf32>
      %36 = math.exp %35 : vector<8x32xf32>
      %cst_27 = arith.constant 1.000000e+00 : f32
      %37 = vector.broadcast %cst_27 : f32 to vector<8x32xf32>
      %38 = arith.addf %37, %36 : vector<8x32xf32>
      %39 = arith.divf %37, %38 : vector<8x32xf32>
      %40 = vector.extract_strided_slice %27 {offsets = [0, 64], sizes = [8, 32], strides = [1, 1]} : vector<8x128xf32> to vector<8x32xf32>
      %41 = math.tanh %40 : vector<8x32xf32>
      %42 = vector.extract_strided_slice %27 {offsets = [0, 96], sizes = [8, 32], strides = [1, 1]} : vector<8x128xf32> to vector<8x32xf32>
      %43 = arith.negf %42 : vector<8x32xf32>
      %44 = math.exp %43 : vector<8x32xf32>
      %cst_28 = arith.constant 1.000000e+00 : f32
      %45 = vector.broadcast %cst_28 : f32 to vector<8x32xf32>
      %46 = arith.addf %45, %44 : vector<8x32xf32>
      %47 = arith.divf %45, %46 : vector<8x32xf32>
      %48 = arith.mulf %39, %arg15 : vector<8x32xf32>
      %49 = arith.mulf %33, %41 : vector<8x32xf32>
      %50 = arith.addf %48, %49 : vector<8x32xf32>
      %51 = math.tanh %50 : vector<8x32xf32>
      %52 = arith.mulf %47, %51 : vector<8x32xf32>
      %53 = vector.broadcast %arg13 : i32 to vector<8x1xi32>
      %54 = arith.cmpi slt, %53, %17 : vector<8x1xi32>
      %55 = arith.extui %54 : vector<8x1xi1> to vector<8x1xi32>
      %56 = arith.sitofp %55 : vector<8x1xi32> to vector<8x1xf32>
      %57 = vector.broadcast %56 : vector<8x1xf32> to vector<8x32xf32>
      %58 = arith.mulf %57, %52 : vector<8x32xf32>
      %cst_29 = arith.constant 1.000000e+00 : f32
      %59 = vector.broadcast %cst_29 : f32 to vector<8x1xf32>
      %60 = arith.subf %59, %56 : vector<8x1xf32>
      %61 = vector.broadcast %60 : vector<8x1xf32> to vector<8x32xf32>
      %62 = arith.mulf %61, %arg14 : vector<8x32xf32>
      %63 = arith.addf %58, %62 : vector<8x32xf32>
      %64 = vector.broadcast %56 : vector<8x1xf32> to vector<8x32xf32>
      %65 = arith.mulf %64, %50 : vector<8x32xf32>
      %cst_30 = arith.constant 1.000000e+00 : f32
      %66 = vector.broadcast %cst_30 : f32 to vector<8x1xf32>
      %67 = arith.subf %66, %56 : vector<8x1xf32>
      %68 = vector.broadcast %67 : vector<8x1xf32> to vector<8x32xf32>
      %69 = arith.mulf %68, %arg15 : vector<8x32xf32>
      %70 = arith.addf %65, %69 : vector<8x32xf32>
      %71 = vector.broadcast %56 : vector<8x1xf32> to vector<8x32xf32>
      %72 = arith.mulf %71, %52 : vector<8x32xf32>
      %73 = arith.index_cast %arg13 : i32 to index
      %c0_31 = arith.constant 0 : index
      %c0_32 = arith.constant 0 : index
      %74 = vector.load %arg9[%73, %c0_31, %c0_32] : memref<8x8x32xf32, #tpu.memory_space<vmem>>, vector<1x8x32xf32>
      %75 = vector.shape_cast %74 : vector<1x8x32xf32> to vector<8x32xf32>
      %76 = vector.shape_cast %72 : vector<8x32xf32> to vector<1x8x32xf32>
      tpu.vector_store %arg9[%73, %c0_31, %c0_32], %76 {strides = array<i32>} : memref<8x8x32xf32, #tpu.memory_space<vmem>>, vector<1x8x32xf32>,
      %c7_i32 = arith.constant 7 : i32
      %77 = arith.subi %c7_i32, %arg13 : i32
      %78 = arith.index_cast %77 : i32 to index
      %c0_33 = arith.constant 0 : index
      %c0_34 = arith.constant 0 : index
      %79 = vector.load %arg12[%78, %c0_33, %c0_34] : memref<8x8x128xf32, #tpu.memory_space<vmem>>, vector<1x8x128xf32>
      %80 = vector.shape_cast %79 : vector<1x8x128xf32> to vector<8x128xf32>
      %81 = arith.truncf %arg16 : vector<8x32xf32> to vector<8x32xbf16>
      %c0_35 = arith.constant 0 : index
      %c0_36 = arith.constant 0 : index
      %82 = vector.load %arg7[%c0_35, %c0_36] : memref<32x128xbf16, #tpu.memory_space<vmem>>, vector<32x128xbf16>
      %cst_37 = arith.constant dense<0.000000e+00> : vector<8x128xf32>
      %83 = tpu.matmul %81, %82, %cst_37 {dimension_numbers = #tpu.dot_dimension_numbers<[1], [0], [0], [1], [0, 0, 1, 1], [], []>} : vector<8x32xbf16>, vector<32x128xbf16>, vector<8x128xf32> -> vector<8x128xf32>
      %84 = arith.addf %80, %83 : vector<8x128xf32>
      %85 = vector.extract_strided_slice %84 {offsets = [0, 0], sizes = [8, 32], strides = [1, 1]} : vector<8x128xf32> to vector<8x32xf32>
      %86 = arith.negf %85 : vector<8x32xf32>
      %87 = math.exp %86 : vector<8x32xf32>
      %cst_38 = arith.constant 1.000000e+00 : f32
      %88 = vector.broadcast %cst_38 : f32 to vector<8x32xf32>
      %89 = arith.addf %88, %87 : vector<8x32xf32>
      %90 = arith.divf %88, %89 : vector<8x32xf32>
      %91 = vector.extract_strided_slice %84 {offsets = [0, 32], sizes = [8, 32], strides = [1, 1]} : vector<8x128xf32> to vector<8x32xf32>
      %92 = arith.negf %91 : vector<8x32xf32>
      %93 = math.exp %92 : vector<8x32xf32>
      %cst_39 = arith.constant 1.000000e+00 : f32
      %94 = vector.broadcast %cst_39 : f32 to vector<8x32xf32>
      %95 = arith.addf %94, %93 : vector<8x32xf32>
      %96 = arith.divf %94, %95 : vector<8x32xf32>
      %97 = vector.extract_strided_slice %84 {offsets = [0, 64], sizes = [8, 32], strides = [1, 1]} : vector<8x128xf32> to vector<8x32xf32>
      %98 = math.tanh %97 : vector<8x32xf32>
      %99 = vector.extract_strided_slice %84 {offsets = [0, 96], sizes = [8, 32], strides = [1, 1]} : vector<8x128xf32> to vector<8x32xf32>
      %100 = arith.negf %99 : vector<8x32xf32>
      %101 = math.exp %100 : vector<8x32xf32>
      %cst_40 = arith.constant 1.000000e+00 : f32
      %102 = vector.broadcast %cst_40 : f32 to vector<8x32xf32>
      %103 = arith.addf %102, %101 : vector<8x32xf32>
      %104 = arith.divf %102, %103 : vector<8x32xf32>
      %105 = arith.mulf %96, %arg17 : vector<8x32xf32>
      %106 = arith.mulf %90, %98 : vector<8x32xf32>
      %107 = arith.addf %105, %106 : vector<8x32xf32>
      %108 = math.tanh %107 : vector<8x32xf32>
      %109 = arith.mulf %104, %108 : vector<8x32xf32>
      %110 = vector.broadcast %77 : i32 to vector<8x1xi32>
      %111 = arith.cmpi slt, %110, %17 : vector<8x1xi32>
      %112 = arith.extui %111 : vector<8x1xi1> to vector<8x1xi32>
      %113 = arith.sitofp %112 : vector<8x1xi32> to vector<8x1xf32>
      %114 = vector.broadcast %113 : vector<8x1xf32> to vector<8x32xf32>
      %115 = arith.mulf %114, %109 : vector<8x32xf32>
      %cst_41 = arith.constant 1.000000e+00 : f32
      %116 = vector.broadcast %cst_41 : f32 to vector<8x1xf32>
      %117 = arith.subf %116, %113 : vector<8x1xf32>
      %118 = vector.broadcast %117 : vector<8x1xf32> to vector<8x32xf32>
      %119 = arith.mulf %118, %arg16 : vector<8x32xf32>
      %120 = arith.addf %115, %119 : vector<8x32xf32>
      %121 = vector.broadcast %113 : vector<8x1xf32> to vector<8x32xf32>
      %122 = arith.mulf %121, %107 : vector<8x32xf32>
      %cst_42 = arith.constant 1.000000e+00 : f32
      %123 = vector.broadcast %cst_42 : f32 to vector<8x1xf32>
      %124 = arith.subf %123, %113 : vector<8x1xf32>
      %125 = vector.broadcast %124 : vector<8x1xf32> to vector<8x32xf32>
      %126 = arith.mulf %125, %arg17 : vector<8x32xf32>
      %127 = arith.addf %122, %126 : vector<8x32xf32>
      %128 = vector.broadcast %113 : vector<8x1xf32> to vector<8x32xf32>
      %129 = arith.mulf %128, %109 : vector<8x32xf32>
      %130 = arith.index_cast %77 : i32 to index
      %c0_43 = arith.constant 0 : index
      %c0_44 = arith.constant 0 : index
      %131 = vector.load %arg10[%130, %c0_43, %c0_44] : memref<8x8x32xf32, #tpu.memory_space<vmem>>, vector<1x8x32xf32>
      %132 = vector.shape_cast %131 : vector<1x8x32xf32> to vector<8x32xf32>
      %133 = vector.shape_cast %129 : vector<8x32xf32> to vector<1x8x32xf32>
      tpu.vector_store %arg10[%130, %c0_43, %c0_44], %133 {strides = array<i32>} : memref<8x8x32xf32, #tpu.memory_space<vmem>>, vector<1x8x32xf32>,
      scf.yield %63, %70, %120, %127 : vector<8x32xf32>, vector<8x32xf32>, vector<8x32xf32>, vector<8x32xf32>
    }
    %c8_i32_20 = arith.constant 8 : i32
    return
  }
  func.func @transform_0(%arg0: i32) -> (i32, i32, i32) {
    %c0_i32 = arith.constant 0 : i32
    %c0_i32_0 = arith.constant 0 : i32
    %c0_i32_1 = arith.constant 0 : i32
    return %c0_i32, %arg0, %c0_i32_0 : i32, i32, i32
  }
  func.func @transform_1(%arg0: i32) -> (i32, i32) {
    %c0_i32 = arith.constant 0 : i32
    %c0_i32_0 = arith.constant 0 : i32
    return %arg0, %c0_i32 : i32, i32
  }
  func.func @transform_2(%arg0: i32) -> (i32, i32) {
    %c0_i32 = arith.constant 0 : i32
    %c0_i32_0 = arith.constant 0 : i32
    %c0_i32_1 = arith.constant 0 : i32
    return %c0_i32, %c0_i32_0 : i32, i32
  }
  func.func @transform_3(%arg0: i32) -> (i32, i32) {
    %c0_i32 = arith.constant 0 : i32
    %c0_i32_0 = arith.constant 0 : i32
    %c0_i32_1 = arith.constant 0 : i32
    return %c0_i32, %c0_i32_0 : i32, i32
  }
  func.func @transform_4(%arg0: i32) -> (i32, i32) {
    %c0_i32 = arith.constant 0 : i32
    %c0_i32_0 = arith.constant 0 : i32
    %c0_i32_1 = arith.constant 0 : i32
    return %c0_i32, %c0_i32_0 : i32, i32
  }
  func.func @transform_5(%arg0: i32) -> (i32, i32) {
    %c0_i32 = arith.constant 0 : i32
    %c0_i32_0 = arith.constant 0 : i32
    %c0_i32_1 = arith.constant 0 : i32
    return %c0_i32, %c0_i32_0 : i32, i32
  }
  func.func @transform_6(%arg0: i32) -> (i32, i32) {
    %c0_i32 = arith.constant 0 : i32
    %c0_i32_0 = arith.constant 0 : i32
    %c0_i32_1 = arith.constant 0 : i32
    return %c0_i32, %c0_i32_0 : i32, i32
  }
  func.func @transform_7(%arg0: i32) -> (i32, i32) {
    %c0_i32 = arith.constant 0 : i32
    %c0_i32_0 = arith.constant 0 : i32
    %c0_i32_1 = arith.constant 0 : i32
    return %c0_i32, %c0_i32_0 : i32, i32
  }
  func.func @transform_8(%arg0: i32) -> (i32, i32, i32) {
    %c0_i32 = arith.constant 0 : i32
    %c0_i32_0 = arith.constant 0 : i32
    %c0_i32_1 = arith.constant 0 : i32
    return %c0_i32, %arg0, %c0_i32_0 : i32, i32, i32
  }
  func.func @transform_9(%arg0: i32) -> (i32, i32, i32) {
    %c0_i32 = arith.constant 0 : i32
    %c0_i32_0 = arith.constant 0 : i32
    %c0_i32_1 = arith.constant 0 : i32
    return %c0_i32, %arg0, %c0_i32_0 : i32, i32, i32
  }
}

module attributes {stable_mosaic.version = 11 : i64} {
  func.func @attn_fusion_kernel(%arg0: i32, %arg1: i32, %arg2: memref<1x24x64xf32, #tpu.memory_space<vmem>>, %arg3: memref<1x8x64xf32, #tpu.memory_space<vmem>>, %arg4: memref<1x24x1xf32, #tpu.memory_space<vmem>>, %arg5: memref<1x1x8xf32, #tpu.memory_space<vmem>>, %arg6: memref<256x64xbf16, #tpu.memory_space<vmem>>, %arg7: memref<1x64xf32, #tpu.memory_space<vmem>>, %arg8: memref<1x24x64xf32, #tpu.memory_space<vmem>>) attributes {dimension_semantics = [#tpu.dimension_semantics<parallel>, #tpu.dimension_semantics<parallel>], iteration_bounds = array<i64: 2, 1>, scalar_prefetch = 0 : i64, scratch_operands = 0 : i64, tpu.core_type = #tpu.core_type<tc>, window_params = [{transform_indices = @transform_0, window_bounds = array<i64: 1, 24, 64>}, {transform_indices = @transform_1, window_bounds = array<i64: 1, 8, 64>}, {transform_indices = @transform_2, window_bounds = array<i64: 1, 24, 1>}, {transform_indices = @transform_3, window_bounds = array<i64: 1, 1, 8>}, {pipeline_mode = #tpu.pipeline_mode<synchronous>, transform_indices = @transform_4, window_bounds = array<i64: 256, 64>}, {pipeline_mode = #tpu.pipeline_mode<synchronous>, transform_indices = @transform_5, window_bounds = array<i64: 1, 64>}, {transform_indices = @transform_6, window_bounds = array<i64: 1, 24, 64>}]} {
    %c0 = arith.constant 0 : index
    %c0_0 = arith.constant 0 : index
    %c0_1 = arith.constant 0 : index
    %0 = vector.load %arg2[%c0, %c0_0, %c0_1] : memref<1x24x64xf32, #tpu.memory_space<vmem>>, vector<1x24x64xf32>
    %1 = vector.shape_cast %0 : vector<1x24x64xf32> to vector<24x64xf32>
    %c0_2 = arith.constant 0 : index
    %c0_3 = arith.constant 0 : index
    %c0_4 = arith.constant 0 : index
    %2 = vector.load %arg3[%c0_2, %c0_3, %c0_4] : memref<1x8x64xf32, #tpu.memory_space<vmem>>, vector<1x8x64xf32>
    %3 = vector.shape_cast %2 : vector<1x8x64xf32> to vector<8x64xf32>
    %c0_5 = arith.constant 0 : index
    %c0_6 = arith.constant 0 : index
    %c0_7 = arith.constant 0 : index
    %4 = vector.load %arg4[%c0_5, %c0_6, %c0_7] : memref<1x24x1xf32, #tpu.memory_space<vmem>>, vector<1x24x1xf32>
    %5 = vector.shape_cast %4 : vector<1x24x1xf32> to vector<24x1xf32>
    %c0_8 = arith.constant 0 : index
    %c0_9 = arith.constant 0 : index
    %c0_10 = arith.constant 0 : index
    %6 = vector.load %arg5[%c0_8, %c0_9, %c0_10] : memref<1x1x8xf32, #tpu.memory_space<vmem>>, vector<1x1x8xf32>
    %7 = vector.shape_cast %6 : vector<1x1x8xf32> to vector<1x8xf32>
    %8 = arith.truncf %1 : vector<24x64xf32> to vector<24x64xbf16>
    %9 = arith.truncf %3 : vector<8x64xf32> to vector<8x64xbf16>
    %cst = arith.constant dense<0.000000e+00> : vector<24x8xf32>
    %10 = tpu.matmul %8, %9, %cst {dimension_numbers = #tpu.dot_dimension_numbers<[1], [1], [0], [0], [0, 0, 1, 0], [], []>} : vector<24x64xbf16>, vector<8x64xbf16>, vector<24x8xf32> -> vector<24x8xf32>
    %cst_11 = arith.constant 1.250000e-01 : f32
    %11 = vector.broadcast %cst_11 : f32 to vector<24x8xf32>
    %12 = arith.mulf %10, %11 : vector<24x8xf32>
    %13 = vector.broadcast %5 : vector<24x1xf32> to vector<24x8xf32>
    %14 = vector.broadcast %7 : vector<1x8xf32> to vector<24x8xf32>
    %15 = arith.mulf %13, %14 : vector<24x8xf32>
    %cst_12 = arith.constant 0.000000e+00 : f32
    %16 = vector.broadcast %cst_12 : f32 to vector<24x8xf32>
    %17 = arith.cmpf ogt, %15, %16 : vector<24x8xf32>
    %cst_13 = arith.constant -1.000000e+09 : f32
    %18 = vector.broadcast %cst_13 : f32 to vector<24x8xf32>
    %19 = arith.select %17, %12, %18 : vector<24x8xi1>, vector<24x8xf32>
    %cst_14 = arith.constant dense<0xFF800000> : vector<24xf32>
    %20 = vector.multi_reduction <maximumf>, %19, %cst_14 [1] : vector<24x8xf32> to vector<24xf32>
    %21 = vector.shape_cast %20 : vector<24xf32> to vector<24x1xf32>
    %22 = vector.broadcast %21 : vector<24x1xf32> to vector<24x8xf32>
    %23 = arith.subf %19, %22 : vector<24x8xf32>
    %24 = math.exp %23 : vector<24x8xf32>
    %cst_15 = arith.constant dense<0.000000e+00> : vector<24xf32>
    %25 = vector.multi_reduction <add>, %24, %cst_15 [1] : vector<24x8xf32> to vector<24xf32>
    %26 = vector.shape_cast %25 : vector<24xf32> to vector<24x1xf32>
    %27 = tpu.reciprocal %26 {approx = true} : vector<24x1xf32> -> vector<24x1xf32>
    %28 = vector.broadcast %27 : vector<24x1xf32> to vector<24x8xf32>
    %29 = arith.mulf %24, %28 : vector<24x8xf32>
    %30 = arith.truncf %29 : vector<24x8xf32> to vector<24x8xbf16>
    %cst_16 = arith.constant dense<0.000000e+00> : vector<24x64xf32>
    %31 = tpu.matmul %30, %9, %cst_16 {dimension_numbers = #tpu.dot_dimension_numbers<[1], [0], [0], [1], [0, 0, 1, 1], [], []>} : vector<24x8xbf16>, vector<8x64xbf16>, vector<24x64xf32> -> vector<24x64xf32>
    %c0_17 = arith.constant 0 : index
    %c0_18 = arith.constant 0 : index
    %32 = vector.load %arg6[%c0_17, %c0_18] : memref<256x64xbf16, #tpu.memory_space<vmem>>, vector<256x64xbf16>
    %33 = arith.truncf %31 : vector<24x64xf32> to vector<24x64xbf16>
    %34 = vector.extract_strided_slice %32 {offsets = [0, 0], sizes = [64, 64], strides = [1, 1]} : vector<256x64xbf16> to vector<64x64xbf16>
    %cst_19 = arith.constant dense<0.000000e+00> : vector<24x64xf32>
    %35 = tpu.matmul %8, %34, %cst_19 {dimension_numbers = #tpu.dot_dimension_numbers<[1], [0], [0], [1], [0, 0, 1, 1], [], []>} : vector<24x64xbf16>, vector<64x64xbf16>, vector<24x64xf32> -> vector<24x64xf32>
    %36 = vector.extract_strided_slice %32 {offsets = [64, 0], sizes = [64, 64], strides = [1, 1]} : vector<256x64xbf16> to vector<64x64xbf16>
    %cst_20 = arith.constant dense<0.000000e+00> : vector<24x64xf32>
    %37 = tpu.matmul %33, %36, %cst_20 {dimension_numbers = #tpu.dot_dimension_numbers<[1], [0], [0], [1], [0, 0, 1, 1], [], []>} : vector<24x64xbf16>, vector<64x64xbf16>, vector<24x64xf32> -> vector<24x64xf32>
    %38 = arith.addf %35, %37 : vector<24x64xf32>
    %39 = arith.mulf %1, %31 : vector<24x64xf32>
    %40 = arith.truncf %39 : vector<24x64xf32> to vector<24x64xbf16>
    %41 = vector.extract_strided_slice %32 {offsets = [128, 0], sizes = [64, 64], strides = [1, 1]} : vector<256x64xbf16> to vector<64x64xbf16>
    %cst_21 = arith.constant dense<0.000000e+00> : vector<24x64xf32>
    %42 = tpu.matmul %40, %41, %cst_21 {dimension_numbers = #tpu.dot_dimension_numbers<[1], [0], [0], [1], [0, 0, 1, 1], [], []>} : vector<24x64xbf16>, vector<64x64xbf16>, vector<24x64xf32> -> vector<24x64xf32>
    %43 = arith.addf %38, %42 : vector<24x64xf32>
    %44 = arith.subf %1, %31 : vector<24x64xf32>
    %45 = arith.truncf %44 : vector<24x64xf32> to vector<24x64xbf16>
    %46 = vector.extract_strided_slice %32 {offsets = [192, 0], sizes = [64, 64], strides = [1, 1]} : vector<256x64xbf16> to vector<64x64xbf16>
    %cst_22 = arith.constant dense<0.000000e+00> : vector<24x64xf32>
    %47 = tpu.matmul %45, %46, %cst_22 {dimension_numbers = #tpu.dot_dimension_numbers<[1], [0], [0], [1], [0, 0, 1, 1], [], []>} : vector<24x64xbf16>, vector<64x64xbf16>, vector<24x64xf32> -> vector<24x64xf32>
    %48 = arith.addf %43, %47 : vector<24x64xf32>
    %c0_23 = arith.constant 0 : index
    %c0_24 = arith.constant 0 : index
    %49 = vector.load %arg7[%c0_23, %c0_24] : memref<1x64xf32, #tpu.memory_space<vmem>>, vector<1x64xf32>
    %50 = vector.broadcast %49 : vector<1x64xf32> to vector<24x64xf32>
    %51 = arith.addf %48, %50 : vector<24x64xf32>
    %52 = math.tanh %51 : vector<24x64xf32>
    %c0_25 = arith.constant 0 : index
    %c0_26 = arith.constant 0 : index
    %c0_27 = arith.constant 0 : index
    %53 = vector.load %arg8[%c0_25, %c0_26, %c0_27] : memref<1x24x64xf32, #tpu.memory_space<vmem>>, vector<1x24x64xf32>
    %54 = vector.shape_cast %53 : vector<1x24x64xf32> to vector<24x64xf32>
    %55 = vector.shape_cast %52 : vector<24x64xf32> to vector<1x24x64xf32>
    tpu.vector_store %arg8[%c0_25, %c0_26, %c0_27], %55 {strides = array<i32>} : memref<1x24x64xf32, #tpu.memory_space<vmem>>, vector<1x24x64xf32>,
    return
  }
  func.func @transform_0(%arg0: i32, %arg1: i32) -> (i32, i32, i32) {
    %c0_i32 = arith.constant 0 : i32
    %c0_i32_0 = arith.constant 0 : i32
    return %arg0, %arg1, %c0_i32 : i32, i32, i32
  }
  func.func @transform_1(%arg0: i32, %arg1: i32) -> (i32, i32, i32) {
    %c0_i32 = arith.constant 0 : i32
    %c0_i32_0 = arith.constant 0 : i32
    %c0_i32_1 = arith.constant 0 : i32
    return %arg0, %c0_i32, %c0_i32_0 : i32, i32, i32
  }
  func.func @transform_2(%arg0: i32, %arg1: i32) -> (i32, i32, i32) {
    %c0_i32 = arith.constant 0 : i32
    %c0_i32_0 = arith.constant 0 : i32
    return %arg0, %arg1, %c0_i32 : i32, i32, i32
  }
  func.func @transform_3(%arg0: i32, %arg1: i32) -> (i32, i32, i32) {
    %c0_i32 = arith.constant 0 : i32
    %c0_i32_0 = arith.constant 0 : i32
    %c0_i32_1 = arith.constant 0 : i32
    return %arg0, %c0_i32, %c0_i32_0 : i32, i32, i32
  }
  func.func @transform_4(%arg0: i32, %arg1: i32) -> (i32, i32) {
    %c0_i32 = arith.constant 0 : i32
    %c0_i32_0 = arith.constant 0 : i32
    %c0_i32_1 = arith.constant 0 : i32
    return %c0_i32, %c0_i32_0 : i32, i32
  }
  func.func @transform_5(%arg0: i32, %arg1: i32) -> (i32, i32) {
    %c0_i32 = arith.constant 0 : i32
    %c0_i32_0 = arith.constant 0 : i32
    %c0_i32_1 = arith.constant 0 : i32
    return %c0_i32, %c0_i32_0 : i32, i32
  }
  func.func @transform_6(%arg0: i32, %arg1: i32) -> (i32, i32, i32) {
    %c0_i32 = arith.constant 0 : i32
    %c0_i32_0 = arith.constant 0 : i32
    return %arg0, %arg1, %c0_i32 : i32, i32, i32
  }
}

module attributes {stable_mosaic.version = 11 : i64} {
  func.func @attn_fusion_kernel(%arg0: i32, %arg1: i32, %arg2: memref<1x8x64xf32, #tpu.memory_space<vmem>>, %arg3: memref<1x24x64xf32, #tpu.memory_space<vmem>>, %arg4: memref<1x8x1xf32, #tpu.memory_space<vmem>>, %arg5: memref<1x1x24xf32, #tpu.memory_space<vmem>>, %arg6: memref<256x64xbf16, #tpu.memory_space<vmem>>, %arg7: memref<1x64xf32, #tpu.memory_space<vmem>>, %arg8: memref<1x8x64xf32, #tpu.memory_space<vmem>>) attributes {dimension_semantics = [#tpu.dimension_semantics<parallel>, #tpu.dimension_semantics<parallel>], iteration_bounds = array<i64: 2, 1>, scalar_prefetch = 0 : i64, scratch_operands = 0 : i64, tpu.core_type = #tpu.core_type<tc>, window_params = [{transform_indices = @transform_0, window_bounds = array<i64: 1, 8, 64>}, {transform_indices = @transform_1, window_bounds = array<i64: 1, 24, 64>}, {transform_indices = @transform_2, window_bounds = array<i64: 1, 8, 1>}, {transform_indices = @transform_3, window_bounds = array<i64: 1, 1, 24>}, {pipeline_mode = #tpu.pipeline_mode<synchronous>, transform_indices = @transform_4, window_bounds = array<i64: 256, 64>}, {pipeline_mode = #tpu.pipeline_mode<synchronous>, transform_indices = @transform_5, window_bounds = array<i64: 1, 64>}, {transform_indices = @transform_6, window_bounds = array<i64: 1, 8, 64>}]} {
    %c0 = arith.constant 0 : index
    %c0_0 = arith.constant 0 : index
    %c0_1 = arith.constant 0 : index
    %0 = vector.load %arg2[%c0, %c0_0, %c0_1] : memref<1x8x64xf32, #tpu.memory_space<vmem>>, vector<1x8x64xf32>
    %1 = vector.shape_cast %0 : vector<1x8x64xf32> to vector<8x64xf32>
    %c0_2 = arith.constant 0 : index
    %c0_3 = arith.constant 0 : index
    %c0_4 = arith.constant 0 : index
    %2 = vector.load %arg3[%c0_2, %c0_3, %c0_4] : memref<1x24x64xf32, #tpu.memory_space<vmem>>, vector<1x24x64xf32>
    %3 = vector.shape_cast %2 : vector<1x24x64xf32> to vector<24x64xf32>
    %c0_5 = arith.constant 0 : index
    %c0_6 = arith.constant 0 : index
    %c0_7 = arith.constant 0 : index
    %4 = vector.load %arg4[%c0_5, %c0_6, %c0_7] : memref<1x8x1xf32, #tpu.memory_space<vmem>>, vector<1x8x1xf32>
    %5 = vector.shape_cast %4 : vector<1x8x1xf32> to vector<8x1xf32>
    %c0_8 = arith.constant 0 : index
    %c0_9 = arith.constant 0 : index
    %c0_10 = arith.constant 0 : index
    %6 = vector.load %arg5[%c0_8, %c0_9, %c0_10] : memref<1x1x24xf32, #tpu.memory_space<vmem>>, vector<1x1x24xf32>
    %7 = vector.shape_cast %6 : vector<1x1x24xf32> to vector<1x24xf32>
    %8 = arith.truncf %1 : vector<8x64xf32> to vector<8x64xbf16>
    %9 = arith.truncf %3 : vector<24x64xf32> to vector<24x64xbf16>
    %cst = arith.constant dense<0.000000e+00> : vector<8x24xf32>
    %10 = tpu.matmul %8, %9, %cst {dimension_numbers = #tpu.dot_dimension_numbers<[1], [1], [0], [0], [0, 0, 1, 0], [], []>} : vector<8x64xbf16>, vector<24x64xbf16>, vector<8x24xf32> -> vector<8x24xf32>
    %cst_11 = arith.constant 1.250000e-01 : f32
    %11 = vector.broadcast %cst_11 : f32 to vector<8x24xf32>
    %12 = arith.mulf %10, %11 : vector<8x24xf32>
    %13 = vector.broadcast %5 : vector<8x1xf32> to vector<8x24xf32>
    %14 = vector.broadcast %7 : vector<1x24xf32> to vector<8x24xf32>
    %15 = arith.mulf %13, %14 : vector<8x24xf32>
    %cst_12 = arith.constant 0.000000e+00 : f32
    %16 = vector.broadcast %cst_12 : f32 to vector<8x24xf32>
    %17 = arith.cmpf ogt, %15, %16 : vector<8x24xf32>
    %cst_13 = arith.constant -1.000000e+09 : f32
    %18 = vector.broadcast %cst_13 : f32 to vector<8x24xf32>
    %19 = arith.select %17, %12, %18 : vector<8x24xi1>, vector<8x24xf32>
    %cst_14 = arith.constant dense<0xFF800000> : vector<8xf32>
    %20 = vector.multi_reduction <maximumf>, %19, %cst_14 [1] : vector<8x24xf32> to vector<8xf32>
    %21 = vector.shape_cast %20 : vector<8xf32> to vector<8x1xf32>
    %22 = vector.broadcast %21 : vector<8x1xf32> to vector<8x24xf32>
    %23 = arith.subf %19, %22 : vector<8x24xf32>
    %24 = math.exp %23 : vector<8x24xf32>
    %cst_15 = arith.constant dense<0.000000e+00> : vector<8xf32>
    %25 = vector.multi_reduction <add>, %24, %cst_15 [1] : vector<8x24xf32> to vector<8xf32>
    %26 = vector.shape_cast %25 : vector<8xf32> to vector<8x1xf32>
    %27 = tpu.reciprocal %26 {approx = true} : vector<8x1xf32> -> vector<8x1xf32>
    %28 = vector.broadcast %27 : vector<8x1xf32> to vector<8x24xf32>
    %29 = arith.mulf %24, %28 : vector<8x24xf32>
    %30 = arith.truncf %29 : vector<8x24xf32> to vector<8x24xbf16>
    %cst_16 = arith.constant dense<0.000000e+00> : vector<8x64xf32>
    %31 = tpu.matmul %30, %9, %cst_16 {dimension_numbers = #tpu.dot_dimension_numbers<[1], [0], [0], [1], [0, 0, 1, 1], [], []>} : vector<8x24xbf16>, vector<24x64xbf16>, vector<8x64xf32> -> vector<8x64xf32>
    %c0_17 = arith.constant 0 : index
    %c0_18 = arith.constant 0 : index
    %32 = vector.load %arg6[%c0_17, %c0_18] : memref<256x64xbf16, #tpu.memory_space<vmem>>, vector<256x64xbf16>
    %33 = arith.truncf %31 : vector<8x64xf32> to vector<8x64xbf16>
    %34 = vector.extract_strided_slice %32 {offsets = [0, 0], sizes = [64, 64], strides = [1, 1]} : vector<256x64xbf16> to vector<64x64xbf16>
    %cst_19 = arith.constant dense<0.000000e+00> : vector<8x64xf32>
    %35 = tpu.matmul %8, %34, %cst_19 {dimension_numbers = #tpu.dot_dimension_numbers<[1], [0], [0], [1], [0, 0, 1, 1], [], []>} : vector<8x64xbf16>, vector<64x64xbf16>, vector<8x64xf32> -> vector<8x64xf32>
    %36 = vector.extract_strided_slice %32 {offsets = [64, 0], sizes = [64, 64], strides = [1, 1]} : vector<256x64xbf16> to vector<64x64xbf16>
    %cst_20 = arith.constant dense<0.000000e+00> : vector<8x64xf32>
    %37 = tpu.matmul %33, %36, %cst_20 {dimension_numbers = #tpu.dot_dimension_numbers<[1], [0], [0], [1], [0, 0, 1, 1], [], []>} : vector<8x64xbf16>, vector<64x64xbf16>, vector<8x64xf32> -> vector<8x64xf32>
    %38 = arith.addf %35, %37 : vector<8x64xf32>
    %39 = arith.mulf %1, %31 : vector<8x64xf32>
    %40 = arith.truncf %39 : vector<8x64xf32> to vector<8x64xbf16>
    %41 = vector.extract_strided_slice %32 {offsets = [128, 0], sizes = [64, 64], strides = [1, 1]} : vector<256x64xbf16> to vector<64x64xbf16>
    %cst_21 = arith.constant dense<0.000000e+00> : vector<8x64xf32>
    %42 = tpu.matmul %40, %41, %cst_21 {dimension_numbers = #tpu.dot_dimension_numbers<[1], [0], [0], [1], [0, 0, 1, 1], [], []>} : vector<8x64xbf16>, vector<64x64xbf16>, vector<8x64xf32> -> vector<8x64xf32>
    %43 = arith.addf %38, %42 : vector<8x64xf32>
    %44 = arith.subf %1, %31 : vector<8x64xf32>
    %45 = arith.truncf %44 : vector<8x64xf32> to vector<8x64xbf16>
    %46 = vector.extract_strided_slice %32 {offsets = [192, 0], sizes = [64, 64], strides = [1, 1]} : vector<256x64xbf16> to vector<64x64xbf16>
    %cst_22 = arith.constant dense<0.000000e+00> : vector<8x64xf32>
    %47 = tpu.matmul %45, %46, %cst_22 {dimension_numbers = #tpu.dot_dimension_numbers<[1], [0], [0], [1], [0, 0, 1, 1], [], []>} : vector<8x64xbf16>, vector<64x64xbf16>, vector<8x64xf32> -> vector<8x64xf32>
    %48 = arith.addf %43, %47 : vector<8x64xf32>
    %c0_23 = arith.constant 0 : index
    %c0_24 = arith.constant 0 : index
    %49 = vector.load %arg7[%c0_23, %c0_24] : memref<1x64xf32, #tpu.memory_space<vmem>>, vector<1x64xf32>
    %50 = vector.broadcast %49 : vector<1x64xf32> to vector<8x64xf32>
    %51 = arith.addf %48, %50 : vector<8x64xf32>
    %52 = math.tanh %51 : vector<8x64xf32>
    %c0_25 = arith.constant 0 : index
    %c0_26 = arith.constant 0 : index
    %c0_27 = arith.constant 0 : index
    %53 = vector.load %arg8[%c0_25, %c0_26, %c0_27] : memref<1x8x64xf32, #tpu.memory_space<vmem>>, vector<1x8x64xf32>
    %54 = vector.shape_cast %53 : vector<1x8x64xf32> to vector<8x64xf32>
    %55 = vector.shape_cast %52 : vector<8x64xf32> to vector<1x8x64xf32>
    tpu.vector_store %arg8[%c0_25, %c0_26, %c0_27], %55 {strides = array<i32>} : memref<1x8x64xf32, #tpu.memory_space<vmem>>, vector<1x8x64xf32>,
    return
  }
  func.func @transform_0(%arg0: i32, %arg1: i32) -> (i32, i32, i32) {
    %c0_i32 = arith.constant 0 : i32
    %c0_i32_0 = arith.constant 0 : i32
    return %arg0, %arg1, %c0_i32 : i32, i32, i32
  }
  func.func @transform_1(%arg0: i32, %arg1: i32) -> (i32, i32, i32) {
    %c0_i32 = arith.constant 0 : i32
    %c0_i32_0 = arith.constant 0 : i32
    %c0_i32_1 = arith.constant 0 : i32
    return %arg0, %c0_i32, %c0_i32_0 : i32, i32, i32
  }
  func.func @transform_2(%arg0: i32, %arg1: i32) -> (i32, i32, i32) {
    %c0_i32 = arith.constant 0 : i32
    %c0_i32_0 = arith.constant 0 : i32
    return %arg0, %arg1, %c0_i32 : i32, i32, i32
  }
  func.func @transform_3(%arg0: i32, %arg1: i32) -> (i32, i32, i32) {
    %c0_i32 = arith.constant 0 : i32
    %c0_i32_0 = arith.constant 0 : i32
    %c0_i32_1 = arith.constant 0 : i32
    return %arg0, %c0_i32, %c0_i32_0 : i32, i32, i32
  }
  func.func @transform_4(%arg0: i32, %arg1: i32) -> (i32, i32) {
    %c0_i32 = arith.constant 0 : i32
    %c0_i32_0 = arith.constant 0 : i32
    %c0_i32_1 = arith.constant 0 : i32
    return %c0_i32, %c0_i32_0 : i32, i32
  }
  func.func @transform_5(%arg0: i32, %arg1: i32) -> (i32, i32) {
    %c0_i32 = arith.constant 0 : i32
    %c0_i32_0 = arith.constant 0 : i32
    %c0_i32_1 = arith.constant 0 : i32
    return %c0_i32, %c0_i32_0 : i32, i32
  }
  func.func @transform_6(%arg0: i32, %arg1: i32) -> (i32, i32, i32) {
    %c0_i32 = arith.constant 0 : i32
    %c0_i32_0 = arith.constant 0 : i32
    return %arg0, %arg1, %c0_i32 : i32, i32, i32
  }
}

</mosaic_0001>

<bundles_post_ra>
// kernel: encoder_forward.4
= control target key start
LH: loop header
LB: loop body
LE: loop exit
PB: predicated region body
PF: predicated region fallthrough
CT: control target
= control target key end

     0   :  { %11 = vsyncpa [#allocation3], 0  ;;  %s1383_s0 = inlined_call_operand.vmem [shape: f32[2,24,64], index: 0, kind: input, shape index: {}]   ;;  %s1384_s1 = inlined_call_operand.vmem [shape: f32[2,8,64], index: 1, kind: input, shape index: {}]   ;;  %s1385_s2 = inlined_call_operand.vmem [shape: f32[2,24,1], index: 2, kind: input, shape index: {}]   ;;  %s1386_s3 = inlined_call_operand.vmem [shape: f32[2,1,8], index: 3, kind: input, shape index: {}]   ;;  %s1387_s4 = inlined_call_operand.vmem [shape: bf16[256,64], index: 4, kind: input, shape index: {}]   ;;  %s1388_s5 = inlined_call_operand.vmem [shape: f32[1,64], index: 5, kind: input, shape index: {}]   ;;  %s1389_s6 = inlined_call_operand.hbm [shape: f32[2,24,64], index: 6, kind: output, shape index: {}]  }
   0x1   :  { %13 = vsyncpa [#allocation3 + $0x1], 0  ;;  %s1172_s21 = smov 0   ;;  %s1174_s22 = smov 0  }
   0x2   :  { %s1176_s23 = smov 0   ;;  %s1178_s24 = smov 0  }
   0x3   :  { %s1180_s25 = smov 0   ;;  %s1182_s26 = smov 0  }
   0x4 LB: > { %s866_s27 = sadd.s32 4294967295, %s1132_s26   ;;  %s867_s28 = sadd.s32 4294967294, %s1132_s26   ;;  %s1132_s26 = sphi %s1182_s26, %s19_s26   ;;  %s1128_s25 = sphi %s1180_s25, %s1399_s25   ;;  %s1124_s24 = sphi %s1178_s24, %s1398_s24   ;;  %s1120_s23 = sphi %s1176_s23, %s1397_s23   ;;  %s1116_s22 = sphi %s1174_s22, %s1396_s22   ;;  %s1112_s21 = sphi %s1172_s21, %s1395_s21  }
   0x5   : > { %s31_s29 = sadd.s32 1, %s1128_s25  ;;  %s190_s30 = sadd.s32 1, %s1120_s23 }
   0x6   : > { %p33_p0 = scmp.ge.s32.totalorder %s31_s29, 2  ;;  %p200_p1 = scmp.ne.s32.totalorder %s1120_s23, %s1116_s22 }
   0x7   : > { %p201_p2 = scmp.eq.s32.totalorder %s866_s27, 1  ;;  %p206_p3 = scmp.ne.s32.totalorder %s1116_s22, %s1112_s21 }
   0x8   : > { %s1401_s29 = smov (%p33_p0, %s31_s29), 0  ;;  %p207_p5 = scmp.eq.s32.totalorder %s867_s28, 1 }
   0x9   : > { %1391 = sst [smem:[#allocation5_spill]] %s1401_s29  ;;  %p1212_p4 = por %p201_p2, %p200_p1 }
   0xa   : > { %s185_s8 = ssub.s32 %s1128_s25, %s1401_s29  ;;  %p870_p6 = scmp.ge.s32.totalorder %s1132_s26, 1 }
   0xb   : > { %p188_p7 = scmp.eq.s32.totalorder %s185_s8, 0  ;;  %p1219_p8 = por %p207_p5, %p206_p3 }
   0xc   : > { %p270_p9 = scmp.lt.s32.totalorder %s1132_s26, 3 }
   0xd   : > { %s1225_s10 = scalar_select %p188_p7, %s1120_s23, %s190_s30  }
   0xe   : > { %p271_p10 = pnand %p870_p6, %p270_p9 }
   0xf   : > { %p321_p11 = scmp.lt.s32.totalorder (!%p271_p10), %s1124_s24, 1  ;;  %s317_s14 = sand.u32 (!%p271_p10), 1, %s1116_s22  }
  0x10   : > { %274 = sbr.rel (%p271_p10) target bundleno = 732 (0x2dc), region = 44 }
  0x11   : > { %s971_s15 = smul.u32 (!%p271_p10), 24, %s317_s14 }
  0x12   : > { %s973_s17 = smul.u32 (!%p271_p10), 24, %s1124_s24 }
  0x14   : > { %s744_s20 = scalar_lea.hbm (!%p271_p10), %s1389_s6, %s973_s17 }
  0x15   : > { %v1134_v0 = vmov 0   ;;  %s322_s11 = scalar_select %p321_p11, %s1124_s24, 1  ;;  %vm360_vm0 = vcmask 523264   ;;  %vm418_vm2 = vcmask 64512   ;;  %vm460_vm5 = vcmask 1043456   ;;  %v956_v48 = vld [vmem:[%s1387_s4 + $0x18] sm:$0xff] }
  0x16   : > { %1032 = vset.pattern.permute.xlu0 %v1134_v0  ;;  %1033 = vset.pattern.permute.xlu1 %v1134_v0  ;;  %v960_v49 = vld [vmem:[%s1387_s4 + $0x38] sm:$0xff]  ;;  %v955_v52 = vld [vmem:[%s1387_s4 + $0x10] sm:$0xff]  ;;  %v954_v54 = vld [vmem:[%s1387_s4 + $0x8] sm:$0xff]  ;;  %s731_s24 = scalar_lea.sflag [#allocation3], %s317_s14 }
  0x17   : > { %s872_s12 = sshll.u32 %s322_s11, 3  ;;  %s972_s13 = smul.u32 24, %s322_s11  ;;  %v964_v50 = vld [vmem:[%s1387_s4 + $0x58] sm:$0xff]  ;;  %v959_v53 = vld [vmem:[%s1387_s4 + $0x30] sm:$0xff] }
  0x18   : > { %s333_s16 = scalar_lea.vmem %s1384_s1, %s872_s12  ;;  %s346_s19 = scalar_lea.vmem %s1386_s3, %s322_s11  ;;  %v968_v51 = vld [vmem:[%s1387_s4 + $0x78] sm:$0xff] }
  0x19   : > { %v352_v1 = vld [vmem:[%s333_s16] sm:$0xff]  ;;  %s342_s28 = scalar_lea.vmem %s1385_s2, %s972_s13  ;;  %s328_s29 = scalar_lea.vmem %s1383_s0, %s972_s13 }
  0x1a   : > { %v1238_v2 = vpack.c.bf16 %v352_v1, %v352_v1  ;;  %v353_v3 = vld [vmem:[%s342_s28] sm:$0xff]  ;;  %v355_v4 = vld [vmem:[%s342_s28 + $0x10] sm:$0xff]  ;;  %v1247_v7 = vld [vmem:[%s328_s29 + $0x8] sm:$0xff]  ;;  %s319_s16 = scalar_lea.vmem [#allocation2], %s971_s15  ;;  %s1074_s12 = scalar_lea.hbm %s1389_s6, 48 }
  0x1b   : > { %393 = vperm.xlu0 %1032, %v353_v3   ;;  %403 = vperm.xlu1 %1033, %v355_v4   ;;  %v1245_v6 = vld [vmem:[%s328_s29] sm:$0xff]  ;;  %v1249_v8 = vld [vmem:[%s328_s29 + $0x10] sm:$0xff]  ;;  %v354_v10 = vld [vmem:[%s342_s28 + $0x8] sm:$0xff]  ;;  %s745_s27 = sshll.u32 %s319_s16, 4  ;;  %s747_s28 = sshll.u32 %s744_s20, 4  ;;  %s746_s27 = int_to_ptr.vmem [resolvable:$true] %s745_s27  ;;  %s748_s28 = int_to_ptr.hbm [resolvable:$true] %s747_s28 }
  0x1c   : > { %v368_v5 = vsel %vm360_vm0, %v1238_v2, 0  ;;  %v1253_v9 = vpack.c.bf16 %v1247_v7, %v1245_v6  ;;  %v1257_v11 = vpack.c.bf16 %v1249_v8, %v1249_v8  ;;  %v1034_v12 = vld [vmem:[%s346_s19] ss:$0 sm:$0xff]  ;;  %v461_v47 = vsel %vm460_vm5, %v1238_v2, 0  ;;  %v963_v3 = vld [vmem:[%s1387_s4 + $0x50] sm:$0xff]  ;;  %s1068_s30 = sshra.s32 %s748_s28, 4  ;;  %s1069_s30 = int_to_ptr.hbm [resolvable:$true] %s1068_s30 }
  0x1d   : > { %377 = vmatpush.bf16.xpose.msra.mxu0 %v368_v5  ;;  %969 = vmatpush.bf16.xpose.msra.mxu2 %v368_v5  ;;  %v953_v2 = vld [vmem:[%s1387_s4] sm:$0xff]  ;;  %v967_v4 = vld [vmem:[%s1387_s4 + $0x70] sm:$0xff]  ;;  %v958_v5 = vld [vmem:[%s1387_s4 + $0x28] sm:$0xff]  ;;  %s1070_s8 = scalar_lea.hbm %s1069_s30, 24  ;;  %p1075_p1 = scmp.lt.s32.totalorder %s1069_s30, %s1389_s6 }
  0x1e   : > { %470 = vmatpush.bf16.msra.mxu1 %v461_v47  ;;  %970 = vmatpush.bf16.msra.mxu3 %v461_v47  ;;  %p1071_p12 = scmp.ne.s32.totalorder %s1069_s30, %s1070_s8  ;;  %p1076_p2 = scmp.lt.s32.totalorder %s1074_s12, %s1070_s8 }
  0x20   : > { %p1072_p13 = pnand %p1071_p12, %p1212_p4  ;;  %p1077_p3 = por %p1076_p2, %p1075_p1 }
  0x22   : > { %591 = vmatpush.bf16.msrb.mxu3 %v956_v48  ;;  %644 = vmatpush.bf16.msrb.mxu1 %v964_v50  ;;  %p1073_p0 = pneg %p1072_p13 }
  0x23   : > { %398 = vperm.xlu0 %1032, %v354_v10   ;;  %v962_v10 = vld [vmem:[%s1387_s4 + $0x48] sm:$0xff] }
  0x24   : > { %874 = vmatmul.msk.bf16.vlgmr.msra.gmra.mxu0 %vm360_vm0, %v1253_v9  ;;  %875 = vmatmul.msk.bf16.vlgmr.msra.gmra.mxu2 %vm360_vm0, %v1257_v11  ;;  %p1078_p5 = pnand %p1077_p3, %p1073_p0 }
  0x25   : > { %549 = vmatpush.bf16.msrb.mxu2 %v960_v49  ;;  %700 = vmatpush.bf16.msrb.mxu0 %v968_v51 }
  0x26   : > { %592 = vmatpush.bf16.msrb.mxu3 %v955_v52  ;;  %645 = vmatpush.bf16.msrb.mxu1 %v963_v3 }
  0x29   : > { %550 = vmatpush.bf16.msrb.mxu2 %v959_v53  ;;  %701 = vmatpush.bf16.msrb.mxu0 %v967_v4 }
  0x2a   : > { %593 = vmatpush.bf16.msrb.mxu3 %v954_v54  ;;  %646 = vmatpush.bf16.msrb.mxu1 %v962_v10 }
  0x2d   : > { %551 = vmatpush.bf16.msrb.mxu2 %v958_v5 }
  0x2e   : > { %594 = vmatpush.bf16.msrb.mxu3 %v953_v2 }
  0x8d   : > { %v394_v13 = vpop.permute.xlu0 %393  ;;  %v404_v20 = vpop.permute.xlu1 %403 }
  0x8e   : > { %v409_v14 = vmul.f32 %v1034_v12, %v394_v13  ;;  %v411_v24 = vmul.f32 %v1034_v12, %v404_v20  ;;  %v957_v13 = vld [vmem:[%s1387_s4 + $0x20] sm:$0xff] }
  0x8f   : > { %552 = vmatpush.bf16.msrb.mxu2 %v957_v13 }
  0x90   : > { %vm412_vm1 = vcmp.gt.f32.partialorder %v409_v14, 0.0  ;;  %vm414_vm4 = vcmp.gt.f32.partialorder %v411_v24, 0.0  ;;  %v961_v14 = vld [vmem:[%s1387_s4 + $0x40] sm:$0xff] }
  0x91   : > { %647 = vmatpush.bf16.msrb.mxu1 %v961_v14 }
  0x95   : > { %v399_v17 = vpop.permute.xlu0 %398 }
  0x96   : > { %v410_v21 = vmul.f32 %v1034_v12, %v399_v17  ;;  %v966_v12 = vld [vmem:[%s1387_s4 + $0x68] sm:$0xff] }
  0x97   : > { %702 = vmatpush.bf16.msrb.mxu0 %v966_v12 }
  0x98   : > { %vm413_vm3 = vcmp.gt.f32.partialorder %v410_v21, 0.0 }
  0xa1   : > { %v379_v15 = vpop.f32.mrf.mxu0 }
  0xa2   : > { %v388_v16 = vmul.f32 0.125, %v379_v15  ;;  %v965_v15 = vld [vmem:[%s1387_s4 + $0x60] sm:$0xff] }
  0xa3   : > { %703 = vmatpush.bf16.msrb.mxu0 %v965_v15 }
  0xa4   : > { %v415_v18 = vsel %vm412_vm1, %v388_v16, -1e+09 }
  0xa5   : > { %v419_v19 = vsel %vm418_vm2, %v415_v18, -inf }
  0xa6   : > { %420 = vmax.xlane.f32.xlu1 %v419_v19 }
  0xa7   : > { %v384_v22 = vpop.f32.mrf.mxu2 }
  0xa8   : > { %v390_v27 = vmul.f32 0.125, %v384_v22 }
  0xa9   : > { %v381_v23 = vpop.f32.mrf.mxu0 }
  0xaa   : > { %v389_v25 = vmul.f32 0.125, %v381_v23  ;;  %v417_v30 = vsel %vm414_vm4, %v390_v27, -1e+09 }
  0xab   : > { %v425_v31 = vsel %vm418_vm2, %v417_v30, -inf }
  0xac   : > { %v416_v26 = vsel %vm413_vm3, %v389_v25, -1e+09 }
  0xad   : > { %v422_v28 = vsel %vm418_vm2, %v416_v26, -inf }
  0xae   : > { %423 = vmax.xlane.f32.xlu2 %v422_v28 }
  0xaf   : > { %v386_v29 = vpop.f32.mrf.mxu2 }
  0xb6   : > { %426 = vmax.xlane.f32.xlu2 %v425_v31 }
 0x119   : > { %v421_v32 = vpop.xlane.xlu1 %420 }
 0x11a   : > { %v428_v33 = vsub.f32 %v415_v18, %v421_v32 }
 0x11c   : > { %v431_v34 = vmul.f32 1.442695, %v428_v33 }
 0x11e   : > { %1036 = vpow2.f32 %v431_v34 }
 0x121   : > { %v424_v35 = vpop.xlane.xlu2 %423 }
 0x122   : > { %v429_v36 = vsub.f32 %v416_v26, %v424_v35 }
 0x124   : > { %v1037_v37 = vpop.eup %1036  ;;  %v433_v38 = vmul.f32 1.442695, %v429_v36  ;;  %v1035_v36 = vld [vmem:[%s1388_s5] ss:$0 sm:$0xff] }
 0x125   : > { %v437_v39 = vsel %vm418_vm2, %v1037_v37, 0.0 }
 0x126   : > { %1038 = vpow2.f32 %v433_v38  ;;  %438 = vadd.xlane.f32.xlu0 %v437_v39 }
 0x129   : > { %v427_v40 = vpop.xlane.xlu2 %426 }
 0x12a   : > { %v430_v41 = vsub.f32 %v417_v30, %v427_v40 }
 0x12c   : > { %v1039_v42 = vpop.eup %1038  ;;  %v435_v43 = vmul.f32 1.442695, %v430_v41 }
 0x12d   : > { %v440_v44 = vsel %vm418_vm2, %v1039_v42, 0.0 }
 0x12e   : > { %1040 = vpow2.f32 %v435_v43  ;;  %441 = vadd.xlane.f32.xlu2 %v440_v44 }
 0x134   : > { %v1041_v45 = vpop.eup %1040 }
 0x135   : > { %v443_v46 = vsel %vm418_vm2, %v1041_v45, 0.0 }
 0x136   : > { %444 = vadd.xlane.f32.xlu2 %v443_v46 }
 0x199   : > { %v439_v55 = vpop.xlane.xlu0 %438 }
 0x19a   : > { %1042 = vrcp.f32 %v439_v55 }
 0x1a0   : > { %v1043_v57 = vpop.eup %1042 }
 0x1a1   : > { %v442_v56 = vpop.xlane.xlu2 %441  ;;  %v449_v60 = vmul.f32 %v1043_v57, %v1037_v37 }
 0x1a2   : > { %1044 = vrcp.f32 %v442_v56 }
 0x1a8   : > { %v1045_v58 = vpop.eup %1044 }
 0x1a9   : > { %v445_v59 = vpop.xlane.xlu2 %444  ;;  %v450_v61 = vmul.f32 %v1045_v58, %v1039_v42 }
 0x1aa   : > { %1046 = vrcp.f32 %v445_v59 }
 0x1ab   : > { %v452_v62 = vpack.c.bf16 %v450_v61, %v449_v60 }
 0x1ad   : > { %876 = vmatmul.msk.bf16.vlgmr.msra.gmra.mxu1 %vm418_vm2, %v452_v62 }
 0x1b0   : > { %v1047_v63 = vpop.eup %1046 }
 0x1b1   : > { %v451_v0 = vmul.f32 %v1047_v63, %v1041_v45 }
 0x1b3   : > { %v453_v1 = vpack.c.bf16 %v451_v0, %v451_v0 }
 0x1b5   : > { %877 = vmatmul.msk.bf16.vlgmr.msra.gmra.mxu3 %vm418_vm2, %v453_v1 }
 0x1c5   : > { %912 = vmatmul.msk.bf16.vlgmr.msrb.gmra.mxu3 %vm360_vm0, %v1253_v9 }
 0x1d5   : > { %913 = vmatmul.msk.bf16.gmra.mxu3 %vm360_vm0, %v1257_v11 }
 0x22a   : > { %v472_v9 = vpop.f32.mrf.mxu1 }
 0x22b   : > { %v605_v16 = vmul.f32 %v472_v9, %v1245_v6  ;;  %v661_v18 = vsub.f32 %v1245_v6, %v472_v9 }
 0x232   : > { %v474_v17 = vpop.f32.mrf.mxu1 }
 0x233   : > { %v513_v19 = vpack.c.bf16 %v474_v17, %v472_v9  ;;  %v606_v20 = vmul.f32 %v474_v17, %v1247_v7  ;;  %v662_v21 = vsub.f32 %v1247_v7, %v474_v17 }
 0x235   : > { %v608_v22 = vpack.c.bf16 %v606_v20, %v605_v16  ;;  %v664_v23 = vpack.c.bf16 %v662_v21, %v661_v18  ;;  %894 = vmatmul.msk.bf16.vlgmr.msrb.gmra.mxu2 %vm360_vm0, %v513_v19 }
 0x237   : > { %930 = vmatmul.msk.bf16.vlgmr.msrb.gmra.mxu1 %vm360_vm0, %v608_v22  ;;  %948 = vmatmul.msk.bf16.vlgmr.msrb.gmra.mxu0 %vm360_vm0, %v664_v23 }
 0x238   : > { %v477_v11 = vpop.f32.mrf.mxu3 }
 0x239   : > { %v607_v25 = vmul.f32 %v477_v11, %v1249_v8  ;;  %v663_v26 = vsub.f32 %v1249_v8, %v477_v11  ;;  %v514_v6 = vpack.c.bf16 %v477_v11, %v477_v11 }
 0x23b   : > { %v609_v27 = vpack.c.bf16 %v607_v25, %v607_v25  ;;  %v665_v28 = vpack.c.bf16 %v663_v26, %v663_v26 }
 0x240   : > { %v479_v24 = vpop.f32.mrf.mxu3 }
 0x245   : > { %895 = vmatmul.msk.bf16.gmra.mxu2 %vm360_vm0, %v514_v6 }
 0x247   : > { %931 = vmatmul.msk.bf16.gmra.mxu1 %vm360_vm0, %v609_v27  ;;  %949 = vmatmul.msk.bf16.gmra.mxu0 %vm360_vm0, %v665_v28 }
 0x248   : > { %v596_v7 = vpop.f32.mrf.mxu3 }
 0x250   : > { %v598_v29 = vpop.f32.mrf.mxu3 }
 0x258   : > { %v601_v30 = vpop.f32.mrf.mxu3 }
 0x260   : > { %v603_v31 = vpop.f32.mrf.mxu3 }
 0x2b4   : > { %v649_v32 = vpop.f32.mrf.mxu1  ;;  %v705_v33 = vpop.f32.mrf.mxu0 }
 0x2b8   : > { %v554_v34 = vpop.f32.mrf.mxu2 }
 0x2b9   : > { %v597_v35 = vadd.f32 %v596_v7, %v554_v34 }
 0x2bb   : > { %v658_v8 = vadd.f32 %v649_v32, %v597_v35 }
 0x2bc   : > { %v651_v37 = vpop.f32.mrf.mxu1  ;;  %v707_v38 = vpop.f32.mrf.mxu0 }
 0x2bd   : > { %v714_v39 = vadd.f32 %v705_v33, %v658_v8 }
 0x2bf   : > { %v721_v40 = vadd.f32 %v1035_v36, %v714_v39 }
 0x2c0   : > { %v556_v41 = vpop.f32.mrf.mxu2 }
 0x2c1   : > { %1048 = vtanh.f32 %v721_v40  ;;  %v599_v42 = vadd.f32 %v598_v29, %v556_v41 }
 0x2c3   : > { %v659_v43 = vadd.f32 %v651_v37, %v599_v42 }
 0x2c4   : > { %v654_v44 = vpop.f32.mrf.mxu1  ;;  %v710_v45 = vpop.f32.mrf.mxu0 }
 0x2c5   : > { %v715_v46 = vadd.f32 %v707_v38, %v659_v43 }
 0x2c7   : > { %v1049_v47 = vpop.eup %1048  ;;  %v722_v48 = vadd.f32 %v1035_v36, %v715_v46 }
 0x2c8   : > { %v559_v49 = vpop.f32.mrf.mxu2  ;;  %727 = vst.msk [vmem:[%s319_s16] sm:$0xff] %vm360_vm0, %v1049_v47 }
 0x2c9   : > { %1050 = vtanh.f32 %v722_v48  ;;  %v602_v50 = vadd.f32 %v601_v30, %v559_v49 }
 0x2cb   : > { %v660_v51 = vadd.f32 %v654_v44, %v602_v50 }
 0x2cc   : > { %v656_v52 = vpop.f32.mrf.mxu1  ;;  %v712_v53 = vpop.f32.mrf.mxu0 }
 0x2cd   : > { %v716_v54 = vadd.f32 %v710_v45, %v660_v51 }
 0x2cf   : > { %v1051_v55 = vpop.eup %1050  ;;  %v723_v56 = vadd.f32 %v1035_v36, %v716_v54 }
 0x2d0   : > { %v561_v57 = vpop.f32.mrf.mxu2  ;;  %728 = vst.msk [vmem:[%s319_s16 + $0x8] sm:$0xff] %vm360_vm0, %v1051_v55 }
 0x2d1   : > { %1052 = vtanh.f32 %v723_v56 }
 0x2d7   : > { %v1053_v58 = vpop.eup %1052 }
 0x2d8   : > { %729 = vst.msk [vmem:[%s319_s16 + $0x10] sm:$0xff] %vm360_vm0, %v1053_v58 }
 0x2d9   : > { %1081 = shalt.err (!%p1078_p5)
}
 0x2da   : > { %s1135_s14 = smov 128   ;;  %s1136_s16 = smov 8  }
 0x2db   : > { %974 = dma.vmem_to_hbm [thread:$0]  (%p1212_p4), %s746_s27, 384, %s748_s28, %s731_s24, %s1135_s14, %s1135_s14, %s1136_s16  }
 0x2dc PF: > { %p980_p6 = scmp.ge.s32.totalorder %s1132_s26, 2  ;;  %s762_s17 = sand.u32 1, %s1112_s21  }
 0x2dd   : > { %s763_s18 = scalar_lea.sflag [#allocation3], %s762_s17 }
 0x2de   : > { %p977_p7 = pnand %p980_p6, %p1219_p8 }
 0x2e0   : > { %p978_p9 = pneg %p977_p7 }
 0x2e2   : > { %1107 = dma.done.wait (%p978_p9), %s763_s18, 384  }
 0x2e3   : > { %1109 = vsyncadd (%p978_p9), %s763_s18, 4294966912  ;;  %s19_s26 = sadd.s32 1, %s1132_s26   ;;  %s1394_s7 = sld [smem:[#allocation5_spill]] }
 0x2e4   : > { %p16_p10 = scmp.ge.s32.totalorder %s19_s26, 4   ;;  %s1395_s21 = smov %s1116_s22 }
 0x2e5   : > { %s1396_s22 = smov %s1120_s23  ;;  %s1397_s23 = smov %s1225_s10 }
 0x2e6   : > { %s1398_s24 = smov %s1128_s25  ;;  %18 = sbr.rel (!%p16_p10) target bundleno = 4 (0x4), region = 88 }
 0x2e9   : > { %s1399_s25 = smov %s1394_s7 }
 0x2eb   :  { %769 = vsyncpa [#allocation3], 1 }
 0x2ec   :  { %771 = vsyncpa [#allocation3 + $0x1], 1 }

// kernel: encoder_forward.3
= control target key start
LH: loop header
LB: loop body
LE: loop exit
PB: predicated region body
PF: predicated region fallthrough
CT: control target
= control target key end

     0   :  { %vm64_vm0 = vcmask 261120   ;;  %v703_v51 = vmov 0.0   ;;  %v705_v52 = vmov 0.0   ;;  %v707_v53 = vmov 0.0   ;;  %s798_s2 = inlined_call_operand.vmem [shape: bf16[32,128], index: 2, kind: input, shape index: {}]   ;;  %s799_s3 = inlined_call_operand.vmem [shape: bf16[32,128], index: 3, kind: input, shape index: {}]   ;;  %s800_s6 = inlined_call_operand.vmem [shape: bf16[32,128], index: 6, kind: input, shape index: {}]   ;;  %s801_s8 = inlined_call_operand.vmem [shape: f32[8,8,32], index: 8, kind: output, shape index: {0}]   ;;  %s802_s9 = inlined_call_operand.vmem [shape: f32[8,8,32], index: 9, kind: output, shape index: {1}]   ;;  %s803_s5 = inlined_call_operand.vmem [shape: bf16[32,128], index: 5, kind: input, shape index: {}]   ;;  %s804_s0 = inlined_call_operand.vmem [shape: f32[8,8,32], index: 0, kind: input, shape index: {}]   ;;  %s805_s4 = inlined_call_operand.vmem [shape: f32[1,128], index: 4, kind: input, shape index: {}]   ;;  %s806_s7 = inlined_call_operand.vmem [shape: f32[1,128], index: 7, kind: input, shape index: {}]   ;;  %s807_s1 = inlined_call_operand.vmem [shape: s32[8,1], index: 1, kind: input, shape index: {}]  }
   0x1   :  { %v473_v0 = vld [vmem:[%s798_s2 + $0x8] sm:$0xff]  ;;  %v472_v2 = vld [vmem:[%s798_s2] sm:$0xff]  ;;  %v34_v10 = vld [vmem:[%s804_s0 + $0x10] sm:$0xff]  ;;  %v709_v54 = vmov 0.0  }
   0x2   :  { %v475_v1 = vld [vmem:[%s803_s5 + $0x8] sm:$0xff]  ;;  %v32_v3 = vld [vmem:[%s804_s0] sm:$0xff]  ;;  %83 = vmatpush.bf16.msra.mxu0 %v473_v0  ;;  %480 = vmatpush.bf16.msra.mxu2 %v473_v0  ;;  %v35_v11 = vld [vmem:[%s804_s0 + $0x18] sm:$0xff] }
   0x3   :  { %v33_v4 = vld [vmem:[%s804_s0 + $0x8] sm:$0xff]  ;;  %v36_v5 = vld [vmem:[%s804_s0 + $0x20] sm:$0xff]  ;;  %140 = vmatpush.bf16.msra.mxu1 %v475_v1  ;;  %482 = vmatpush.bf16.msra.mxu3 %v475_v1  ;;  %v38_v12 = vld [vmem:[%s804_s0 + $0x30] sm:$0xff]  ;;  %v41_v14 = vpack.c.bf16 %v35_v11, %v34_v10 }
   0x4   :  { %v37_v6 = vld [vmem:[%s804_s0 + $0x28] sm:$0xff]  ;;  %v474_v7 = vld [vmem:[%s803_s5] sm:$0xff]  ;;  %v40_v8 = vpack.c.bf16 %v33_v4, %v32_v3  ;;  %v39_v13 = vld [vmem:[%s804_s0 + $0x38] sm:$0xff] }
   0x5   :  { %v42_v9 = vpack.c.bf16 %v37_v6, %v36_v5  ;;  %v43_v15 = vpack.c.bf16 %v39_v13, %v38_v12  ;;  %v528_v16 = vld [vmem:[%s805_s4] ss:$0 sm:$0xff] }
   0x6   :  { %84 = vmatpush.bf16.msra.mxu0 %v472_v2  ;;  %481 = vmatpush.bf16.msra.mxu2 %v472_v2  ;;  %v529_v17 = vld [vmem:[%s806_s7] ss:$0 sm:$0xff] }
   0x7   :  { %141 = vmatpush.bf16.msra.mxu1 %v474_v7  ;;  %483 = vmatpush.bf16.msra.mxu3 %v474_v7  ;;  %v701_v22 = vld [vmem:[%s807_s1] sm:$0xff]  ;;  %s711_s1 = smov 0  }
   0x9   :  { %432 = vmatmul.msk.bf16.vlgmr.msra.gmra.mxu0 %vm64_vm0, %v40_v8  ;;  %434 = vmatmul.msk.bf16.vlgmr.msra.gmra.mxu2 %vm64_vm0, %v42_v9 }
   0xa   :  { %444 = vmatmul.msk.bf16.vlgmr.msra.gmra.mxu1 %vm64_vm0, %v40_v8  ;;  %446 = vmatmul.msk.bf16.vlgmr.msra.gmra.mxu3 %vm64_vm0, %v42_v9 }
  0x19   :  { %433 = vmatmul.msk.bf16.gmra.mxu0 %vm64_vm0, %v41_v14  ;;  %435 = vmatmul.msk.bf16.gmra.mxu2 %vm64_vm0, %v43_v15 }
  0x1a   :  { %445 = vmatmul.msk.bf16.gmra.mxu1 %vm64_vm0, %v41_v14  ;;  %447 = vmatmul.msk.bf16.gmra.mxu3 %vm64_vm0, %v43_v15 }
  0x86   :  { %v86_v18 = vpop.f32.mrf.mxu0 }
  0x87   :  { %v87_v19 = vadd.f32 %v528_v16, %v86_v18  ;;  %v143_v20 = vpop.f32.mrf.mxu1 }
  0x88   :  { %v144_v21 = vadd.f32 %v529_v17, %v143_v20 }
  0x89   :  { %106 = vst [vmem:[#allocation2] sm:$0xff] %v87_v19 }
  0x8a   :  { %163 = vst [vmem:[#allocation3] sm:$0xff] %v144_v21 }
  0x8c   :  { %v96_v23 = vpop.f32.mrf.mxu2 }
  0x8d   :  { %v97_v24 = vadd.f32 %v528_v16, %v96_v23  ;;  %v153_v25 = vpop.f32.mrf.mxu3 }
  0x8e   :  { %v154_v26 = vadd.f32 %v529_v17, %v153_v25  ;;  %v88_v27 = vpop.f32.mrf.mxu0 }
  0x8f   :  { %110 = vst [vmem:[#allocation2 + $0x20] sm:$0xff] %v97_v24  ;;  %v89_v28 = vadd.f32 %v528_v16, %v88_v27  ;;  %v145_v29 = vpop.f32.mrf.mxu1 }
  0x90   :  { %167 = vst [vmem:[#allocation3 + $0x20] sm:$0xff] %v154_v26  ;;  %v146_v30 = vadd.f32 %v529_v17, %v145_v29 }
  0x91   :  { %107 = vst [vmem:[#allocation2 + $0x8] sm:$0xff] %v89_v28 }
  0x92   :  { %164 = vst [vmem:[#allocation3 + $0x8] sm:$0xff] %v146_v30 }
  0x94   :  { %v98_v31 = vpop.f32.mrf.mxu2 }
  0x95   :  { %v99_v32 = vadd.f32 %v528_v16, %v98_v31  ;;  %v155_v33 = vpop.f32.mrf.mxu3 }
  0x96   :  { %v156_v34 = vadd.f32 %v529_v17, %v155_v33  ;;  %v91_v35 = vpop.f32.mrf.mxu0 }
  0x97   :  { %111 = vst [vmem:[#allocation2 + $0x28] sm:$0xff] %v99_v32  ;;  %v92_v36 = vadd.f32 %v528_v16, %v91_v35  ;;  %v148_v37 = vpop.f32.mrf.mxu1 }
  0x98   :  { %168 = vst [vmem:[#allocation3 + $0x28] sm:$0xff] %v156_v34  ;;  %v149_v38 = vadd.f32 %v529_v17, %v148_v37 }
  0x99   :  { %108 = vst [vmem:[#allocation2 + $0x10] sm:$0xff] %v92_v36 }
  0x9a   :  { %165 = vst [vmem:[#allocation3 + $0x10] sm:$0xff] %v149_v38 }
  0x9c   :  { %v101_v39 = vpop.f32.mrf.mxu2 }
  0x9d   :  { %v102_v40 = vadd.f32 %v528_v16, %v101_v39  ;;  %v158_v41 = vpop.f32.mrf.mxu3 }
  0x9e   :  { %v159_v42 = vadd.f32 %v529_v17, %v158_v41  ;;  %v93_v43 = vpop.f32.mrf.mxu0 }
  0x9f   :  { %112 = vst [vmem:[#allocation2 + $0x30] sm:$0xff] %v102_v40  ;;  %v94_v44 = vadd.f32 %v528_v16, %v93_v43  ;;  %v150_v45 = vpop.f32.mrf.mxu1 }
  0xa0   :  { %169 = vst [vmem:[#allocation3 + $0x30] sm:$0xff] %v159_v42  ;;  %v151_v46 = vadd.f32 %v529_v17, %v150_v45 }
  0xa1   :  { %109 = vst [vmem:[#allocation2 + $0x18] sm:$0xff] %v94_v44 }
  0xa2   :  { %166 = vst [vmem:[#allocation3 + $0x18] sm:$0xff] %v151_v46 }
  0xa4   :  { %v103_v47 = vpop.f32.mrf.mxu2 }
  0xa5   :  { %v104_v48 = vadd.f32 %v528_v16, %v103_v47  ;;  %v160_v49 = vpop.f32.mrf.mxu3 }
  0xa6   :  { %v161_v50 = vadd.f32 %v529_v17, %v160_v49 }
  0xa7   :  { %113 = vst [vmem:[#allocation2 + $0x38] sm:$0xff] %v104_v48 }
  0xa8   :  { %170 = vst [vmem:[#allocation3 + $0x38] sm:$0xff] %v161_v50 }
  0xa9 LB: > { %v477_v55 = vld [vmem:[%s799_s3 + $0x8] sm:$0xff]  ;;  %v185_v56 = vpack.c.bf16 %v588_v54, %v588_v54  ;;  %v476_v57 = vld [vmem:[%s799_s3] sm:$0xff]  ;;  %s594_s17 = smov 32   ;;  %v290_v58 = vpack.c.bf16 %v580_v52, %v580_v52  ;;  %s448_s22 = sshll.u32 %s592_s1, 3  ;;  %v596_v16 = vmov 0   ;;  %v259_v39 = vstv %s592_s1  ;;  %s592_s1 = sphi %s711_s1, %s177_s1   ;;  %v588_v54 = vphi %v709_v54, %v276_v54   ;;  %v584_v53 = vphi %v707_v53, %v279_v53   ;;  %v580_v52 = vphi %v705_v52, %v381_v52   ;;  %v576_v51 = vphi %v703_v51, %v384_v51  }
  0xaa   : > { %214 = vmatpush.bf16.msra.mxu0 %v477_v55  ;;  %v479_v59 = vld [vmem:[%s800_s6 + $0x8] sm:$0xff]  ;;  %v478_v60 = vld [vmem:[%s800_s6] sm:$0xff]  ;;  %s286_s2 = ssub.s32 7, %s592_s1  ;;  %s183_s23 = scalar_lea.vmem [#allocation2], %s448_s22  ;;  %530 = vset.pattern.permute.xlu2 %v596_v16  ;;  %vm260_vm10 = vcmp.lt.s32.totalorder %v259_v39, %v701_v22  ;;  %v597_v43 = vmov 0.0  }
  0xab   : > { %191 = vrot.lane.b32.xlu0 %v185_v56, %s594_s17  ;;  %319 = vmatpush.bf16.msra.mxu1 %v479_v59  ;;  %s754_s24 = sshll.u32 %s286_s2, 3  ;;  %s595_s5 = smov 64   ;;  %v364_v37 = vstv %s286_s2  ;;  %v459_v44 = vsel %vm260_vm10, 1.0, %v597_v43 }
  0xac   : > { %s288_s25 = scalar_lea.vmem [#allocation3], %s754_s24  ;;  %536 = vset.pattern.permute.xlu0 %v596_v16  ;;  %537 = vset.pattern.permute.xlu1 %v596_v16  ;;  %vm365_vm9 = vcmp.lt.s32.totalorder %v364_v37, %v701_v22  ;;  %s284_s28 = scalar_lea.vmem %s801_s8, %s448_s22 }
  0xad   : > { %v471_v45 = vsel %vm365_vm9, 1.0, %v597_v43  ;;  %s389_s10 = scalar_lea.vmem %s802_s9, %s754_s24  ;;  %s177_s1 = sadd.s32 1, %s592_s1  }
  0xae   : > { %215 = vmatpush.bf16.msra.mxu0 %v476_v57  ;;  %v184_v63 = vld [vmem:[%s183_s23] sm:$0xff]  ;;  %v531_v46 = vpack.i.bf16 %v471_v45, %v459_v44  ;;  %p174_p0 = scmp.ge.s32.totalorder %s177_s1, 8  }
  0xaf   : > { %320 = vmatpush.bf16.msra.mxu1 %v478_v60  ;;  %v289_v2 = vld [vmem:[%s288_s25] sm:$0xff]  ;;  %v374_v60 = vsub.f32 1.0, %v471_v45 }
  0xb3   : > { %296 = vrot.lane.b32.xlu0 %v290_v58, %s594_s17  ;;  %v269_v58 = vsub.f32 1.0, %v459_v44 }
 0x11d   : > { %v192_v61 = vpop.permute.xlu0 %191 }
 0x11e   : > { %457 = vmatmul.msk.bf16.vlgmr.msra.gmra.mxu0 %vm64_vm0, %v192_v61 }
 0x125   : > { %v297_v62 = vpop.permute.xlu0 %296 }
 0x126   : > { %469 = vmatmul.msk.bf16.vlgmr.msra.gmra.mxu1 %vm64_vm0, %v297_v62 }
 0x19b   : > { %v217_v0 = vpop.f32.mrf.mxu0 }
 0x19c   : > { %v221_v1 = vadd.f32 %v217_v0, %v184_v63 }
 0x19e   : > { %538 = vtanh.f32 %v221_v1  ;;  %v458_v9 = vmul.f32 -1.442695, %v221_v1 }
 0x1a3   : > { %v219_v3 = vpop.f32.mrf.mxu0  ;;  %v322_v4 = vpop.f32.mrf.mxu1 }
 0x1a4   : > { %v539_v5 = vpop.eup %538  ;;  %v326_v6 = vadd.f32 %v322_v4, %v289_v2 }
 0x1a5   : > { %244 = vrot.lane.b32.xlu1 %v539_v5, %s595_s5 }
 0x1a6   : > { %540 = vtanh.f32 %v326_v6  ;;  %v470_v10 = vmul.f32 -1.442695, %v326_v6 }
 0x1a7   : > { %542 = vpow2.f32 %v458_v9 }
 0x1a8   : > { %544 = vpow2.f32 %v470_v10 }
 0x1ab   : > { %v324_v7 = vpop.f32.mrf.mxu1 }
 0x1ac   : > { %v541_v8 = vpop.eup %540 }
 0x1ad   : > { %349 = vrot.lane.b32.xlu1 %v541_v8, %s595_s5  ;;  %v543_v11 = vpop.eup %542 }
 0x1ae   : > { %v225_v12 = vadd.f32 1.0, %v543_v11  ;;  %v545_v13 = vpop.eup %544 }
 0x1af   : > { %v330_v14 = vadd.f32 1.0, %v545_v13 }
 0x1b0   : > { %546 = vrcp.f32 %v225_v12  ;;  %v237_v25 = vand.u32 2147483648, %v225_v12  ;;  %vm231_vm2 = vweird.f32 %v225_v12  ;;  %v235_v26 = vand.u32 2147483647, %v225_v12 }
 0x1b1   : > { %548 = vrcp.f32 %v330_v14  ;;  %v342_v34 = vand.u32 2147483648, %v330_v14  ;;  %vm336_vm6 = vweird.f32 %v330_v14  ;;  %v340_v35 = vand.u32 2147483647, %v330_v14 }
 0x1b2   : > { %v238_v29 = vor.u32 1.1754944e-38, %v237_v25  ;;  %vm236_vm4 = vcmp.eq.f32.partialorder %v235_v26, 8.507059e+37 }
 0x1b3   : > { %v343_v38 = vor.u32 1.1754944e-38, %v342_v34  ;;  %vm341_vm8 = vcmp.eq.f32.partialorder %v340_v35, 8.507059e+37 }
 0x1b6   : > { %v547_v15 = vpop.eup %546 }
 0x1b7   : > { %v227_v17 = vmul.f32 %v547_v15, %v225_v12  ;;  %v549_v19 = vpop.eup %548  ;;  %vm232_vm1 = vweird.f32 %v547_v15 }
 0x1b8   : > { %v332_v21 = vmul.f32 %v549_v19, %v330_v14  ;;  %vm233_vm3 = vmor %vm231_vm2, %vm232_vm1  ;;  %vm337_vm5 = vweird.f32 %v549_v19 }
 0x1b9   : > { %v228_v18 = vsub.f32 1.0, %v227_v17  ;;  %vm338_vm7 = vmor %vm336_vm6, %vm337_vm5 }
 0x1ba   : > { %v333_v24 = vsub.f32 1.0, %v332_v21 }
 0x1bb   : > { %v229_v20 = vmul.f32 %v547_v15, %v228_v18 }
 0x1bc   : > { %v334_v28 = vmul.f32 %v549_v19, %v333_v24 }
 0x1bd   : > { %v230_v23 = vadd.f32 %v547_v15, %v229_v20 }
 0x1be   : > { %v335_v33 = vadd.f32 %v549_v19, %v334_v28 }
 0x1bf   : > { %v234_v27 = vsel %vm233_vm3, %v547_v15, %v230_v23 }
 0x1c0   : > { %v239_v31 = vsel %vm236_vm4, %v238_v29, %v234_v27  ;;  %v339_v36 = vsel %vm338_vm7, %v549_v19, %v335_v33 }
 0x1c1   : > { %v344_v41 = vsel %vm341_vm8, %v343_v38, %v339_v36  ;;  %v242_v47 = vmul.f32 %v584_v53, %v239_v31 }
 0x1c2   : > { %v347_v50 = vmul.f32 %v576_v51, %v344_v41 }
 0x217   : > { %v245_v30 = vpop.permute.xlu1 %244 }
 0x218   : > { %v247_v32 = vmul.f32 %v245_v30, %v239_v31 }
 0x21a   : > { %249 = vrot.lane.b32.xlu2 %v247_v32, %s594_s17 }
 0x21f   : > { %v350_v40 = vpop.permute.xlu1 %349 }
 0x220   : > { %v352_v42 = vmul.f32 %v350_v40, %v344_v41 }
 0x222   : > { %354 = vrot.lane.b32.xlu2 %v352_v42, %s594_s17 }
 0x22a   : > { %532 = vperm.xlu2 %530, %v531_v46  }
 0x274   : > { %v250_v48 = vpop.permute.xlu2 %249 }
 0x275   : > { %v252_v49 = vadd.f32 %v250_v48, %v242_v47 }
 0x277   : > { %550 = vtanh.f32 %v252_v49 }
 0x27c   : > { %v355_v55 = vpop.permute.xlu2 %354 }
 0x27d   : > { %v551_v56 = vpop.eup %550  ;;  %v357_v57 = vadd.f32 %v355_v55, %v347_v50 }
 0x27e   : > { %255 = vrot.lane.b32.xlu0 %v551_v56, %s595_s5 }
 0x27f   : > { %552 = vtanh.f32 %v357_v57 }
 0x284   : > { %v533_v61 = vpop.permute.xlu2 %532 }
 0x285   : > { %v553_v59 = vpop.eup %552  ;;  %v534_v63 = vunpack.i.l.bf16 %v533_v61  ;;  %v535_v2 = vunpack.i.h.bf16 %v533_v61 }
 0x286   : > { %272 = vperm.xlu0 %536, %v269_v58   ;;  %360 = vrot.lane.b32.xlu1 %v553_v59, %s595_s5 }
 0x287   : > { %v277_v5 = vmul.f32 %v534_v63, %v252_v49  ;;  %v382_v11 = vmul.f32 %v535_v2, %v357_v57 }
 0x28e   : > { %377 = vperm.xlu1 %537, %v374_v60  }
 0x2f0   : > { %v256_v62 = vpop.permute.xlu0 %255 }
 0x2f1   : > { %v258_v0 = vmul.f32 %v256_v62, %v239_v31 }
 0x2f3   : > { %v268_v1 = vmul.f32 %v534_v63, %v258_v0 }
 0x2f5   : > { %281 = vrot.lane.b32.xlu2 %v268_v1, %s594_s17 }
 0x2f8   : > { %v273_v3 = vpop.permute.xlu0 %272  ;;  %v361_v4 = vpop.permute.xlu1 %360 }
 0x2f9   : > { %v275_v6 = vmul.f32 %v588_v54, %v273_v3  ;;  %v278_v7 = vmul.f32 %v584_v53, %v273_v3  ;;  %v363_v8 = vmul.f32 %v361_v4, %v344_v41 }
 0x2fb   : > { %v276_v54 = vadd.f32 %v275_v6, %v268_v1   ;;  %v279_v53 = vadd.f32 %v278_v7, %v277_v5   ;;  %v373_v9 = vmul.f32 %v535_v2, %v363_v8 }
 0x2fd   : > { %386 = vrot.lane.b32.xlu1 %v373_v9, %s594_s17 }
 0x300   : > { %v378_v10 = vpop.permute.xlu1 %377 }
 0x301   : > { %v380_v12 = vmul.f32 %v580_v52, %v378_v10  ;;  %v383_v13 = vmul.f32 %v576_v51, %v378_v10 }
 0x303   : > { %v381_v52 = vadd.f32 %v380_v12, %v373_v9   ;;  %v384_v51 = vadd.f32 %v383_v13, %v382_v11  }
 0x34f   : > { %v282_v14 = vpop.permute.xlu2 %281 }
 0x350   : > { %285 = vst.msk [vmem:[%s284_s28] sm:$0xff] %vm64_vm0, %v282_v14 }
 0x36c   :  { %176 = sbr.rel (!%p174_p0) target bundleno = 169 (0xa9), region = 71 }
 0x36f   : > { %v387_v15 = vpop.permute.xlu1 %386 }
 0x370   : > { %390 = vst.msk [vmem:[%s389_s10] sm:$0xff] %vm64_vm0, %v387_v15 }

// kernel: encoder_forward.5
= control target key start
LH: loop header
LB: loop body
LE: loop exit
PB: predicated region body
PF: predicated region fallthrough
CT: control target
= control target key end

     0   :  { %11 = vsyncpa [#allocation3], 0  ;;  %s1193_s0 = inlined_call_operand.vmem [shape: f32[2,8,64], index: 0, kind: input, shape index: {}]   ;;  %s1194_s1 = inlined_call_operand.vmem [shape: f32[2,24,64], index: 1, kind: input, shape index: {}]   ;;  %s1195_s2 = inlined_call_operand.vmem [shape: f32[2,8,1], index: 2, kind: input, shape index: {}]   ;;  %s1196_s3 = inlined_call_operand.vmem [shape: f32[2,1,24], index: 3, kind: input, shape index: {}]   ;;  %s1197_s4 = inlined_call_operand.vmem [shape: bf16[256,64], index: 4, kind: input, shape index: {}]   ;;  %s1198_s5 = inlined_call_operand.vmem [shape: f32[1,64], index: 5, kind: input, shape index: {}]   ;;  %s1199_s6 = inlined_call_operand.hbm [shape: f32[2,8,64], index: 6, kind: output, shape index: {}]  }
   0x1   :  { %13 = vsyncpa [#allocation3 + $0x1], 0  ;;  %s1019_s21 = smov 0   ;;  %s1021_s22 = smov 0  }
   0x2   :  { %s1023_s23 = smov 0   ;;  %s1025_s24 = smov 0  }
   0x3   :  { %s1027_s25 = smov 0   ;;  %s1029_s26 = smov 0  }
   0x4 LB: > { %s738_s27 = sadd.s32 4294967295, %s981_s26   ;;  %s739_s28 = sadd.s32 4294967294, %s981_s26   ;;  %s981_s26 = sphi %s1029_s26, %s19_s26   ;;  %s977_s25 = sphi %s1027_s25, %s1206_s25   ;;  %s973_s24 = sphi %s1025_s24, %s1205_s24   ;;  %s969_s23 = sphi %s1023_s23, %s1204_s23   ;;  %s965_s22 = sphi %s1021_s22, %s1203_s22   ;;  %s961_s21 = sphi %s1019_s21, %s1202_s21  }
   0x5   : > { %s31_s29 = sadd.s32 1, %s977_s25  ;;  %s190_s30 = sadd.s32 1, %s969_s23 }
   0x6   : > { %p33_p0 = scmp.ge.s32.totalorder %s31_s29, 2  ;;  %p200_p1 = scmp.ne.s32.totalorder %s969_s23, %s965_s22 }
   0x7   : > { %p201_p2 = scmp.eq.s32.totalorder %s738_s27, 1  ;;  %p206_p3 = scmp.ne.s32.totalorder %s965_s22, %s961_s21 }
   0x8   : > { %s1208_s29 = smov (%p33_p0, %s31_s29), 0  ;;  %p207_p5 = scmp.eq.s32.totalorder %s739_s28, 1 }
   0x9   : > { %p1059_p4 = por %p201_p2, %p200_p1  ;;  %s185_s8 = ssub.s32 %s977_s25, %s1208_s29 }
   0xa   : > { %p742_p6 = scmp.ge.s32.totalorder %s981_s26, 1  ;;  %p188_p7 = scmp.eq.s32.totalorder %s185_s8, 0 }
   0xb   : > { %p1066_p8 = por %p207_p5, %p206_p3  ;;  %p265_p9 = scmp.lt.s32.totalorder %s981_s26, 3 }
   0xc   : > { %s1072_s10 = scalar_select %p188_p7, %s969_s23, %s190_s30  }
   0xd   : > { %p266_p10 = pnand %p742_p6, %p265_p9 }
   0xe   : > { %p312_p11 = scmp.lt.s32.totalorder (!%p266_p10), %s973_s24, 1  ;;  %s818_s20 = sshll.u32 (!%p266_p10), %s973_s24, 3 }
   0xf   : > { %269 = sbr.rel (%p266_p10) target bundleno = 707 (0x2c3), region = 44  ;;  %s626_s30 = scalar_lea.hbm (!%p266_p10), %s1199_s6, %s818_s20 }
  0x10   : > { %s923_s18 = scalar_lea.hbm (!%p266_p10), %s1199_s6, 16 }
  0x14   : > { %v983_v0 = vmov 0   ;;  %s313_s11 = scalar_select %p312_p11, %s973_s24, 1  ;;  %vm344_vm0 = vcmask 523264   ;;  %vm379_vm2 = vcmask 195584   ;;  %vm395_vm3 = vcmask 1043456   ;;  %v824_v25 = vld [vmem:[%s1197_s4 + $0x18] sm:$0xff] }
  0x15   : > { %894 = vset.pattern.permute.xlu0 %v983_v0  ;;  %v828_v26 = vld [vmem:[%s1197_s4 + $0x38] sm:$0xff]  ;;  %512 = vmatpush.bf16.msra.mxu3 %v824_v25  ;;  %v823_v29 = vld [vmem:[%s1197_s4 + $0x10] sm:$0xff]  ;;  %v822_v33 = vld [vmem:[%s1197_s4 + $0x8] sm:$0xff] }
  0x16   : > { %s837_s12 = smul.u32 24, %s313_s11  ;;  %s744_s13 = sshll.u32 %s313_s11, 3  ;;  %v832_v27 = vld [vmem:[%s1197_s4 + $0x58] sm:$0xff]  ;;  %475 = vmatpush.bf16.msra.mxu2 %v828_v26  ;;  %v827_v30 = vld [vmem:[%s1197_s4 + $0x30] sm:$0xff]  ;;  %v826_v34 = vld [vmem:[%s1197_s4 + $0x28] sm:$0xff] }
  0x17   : > { %s330_s16 = scalar_lea.vmem %s1195_s2, %s744_s13  ;;  %s333_s28 = scalar_lea.vmem %s1196_s3, %s313_s11  ;;  %v836_v28 = vld [vmem:[%s1197_s4 + $0x78] sm:$0xff]  ;;  %v831_v31 = vld [vmem:[%s1197_s4 + $0x50] sm:$0xff]  ;;  %v830_v35 = vld [vmem:[%s1197_s4 + $0x48] sm:$0xff] }
  0x18   : > { %s323_s19 = scalar_lea.vmem %s1194_s1, %s837_s12  ;;  %v339_v1 = vld [vmem:[%s330_s16] sm:$0xff]  ;;  %s318_s12 = scalar_lea.vmem %s1193_s0, %s744_s13  ;;  %v835_v32 = vld [vmem:[%s1197_s4 + $0x70] sm:$0xff]  ;;  %v834_v36 = vld [vmem:[%s1197_s4 + $0x68] sm:$0xff] }
  0x19   : > { %v338_v2 = vld [vmem:[%s323_s19 + $0x10] sm:$0xff]  ;;  %370 = vperm.xlu0 %894, %v339_v1   ;;  %v336_v4 = vld [vmem:[%s323_s19] sm:$0xff]  ;;  %v337_v5 = vld [vmem:[%s323_s19 + $0x8] sm:$0xff]  ;;  %513 = vmatpush.bf16.msra.mxu3 %v823_v29  ;;  %s309_s16 = sand.u32 1, %s965_s22   ;;  %s630_s11 = sshll.u32 %s626_s30, 4  ;;  %s631_s11 = int_to_ptr.hbm [resolvable:$true] %s630_s11 }
  0x1a   : > { %v343_v3 = vpack.c.bf16 %v338_v2, %v338_v2  ;;  %v342_v7 = vpack.c.bf16 %v337_v5, %v336_v4  ;;  %v1090_v9 = vld [vmem:[%s318_s12] sm:$0xff]  ;;  %476 = vmatpush.bf16.msra.mxu2 %v827_v30  ;;  %s743_s19 = sshll.u32 %s309_s16, 3  ;;  %s615_s13 = scalar_lea.sflag [#allocation3], %s309_s16 }
  0x1b   : > { %v341_v10 = vpack.c.bf16 %v1090_v9, %v1090_v9  ;;  %v895_v11 = vld [vmem:[%s333_s28] ss:$0 sm:$0xff]  ;;  %s311_s8 = scalar_lea.vmem [#allocation2], %s743_s19  ;;  %s917_s14 = sshra.s32 %s631_s11, 4  ;;  %s918_s14 = int_to_ptr.hbm [resolvable:$true] %s917_s14 }
  0x1c   : > { %v352_v6 = vsel %vm344_vm0, %v343_v3, 0  ;;  %v349_v8 = vsel %vm344_vm0, %v342_v7, 0  ;;  %v396_v24 = vsel %vm395_vm3, %v343_v3, 0  ;;  %v821_v37 = vld [vmem:[%s1197_s4] sm:$0xff]  ;;  %s628_s12 = sshll.u32 %s311_s8, 4  ;;  %s919_s24 = scalar_lea.hbm %s918_s14, 8  ;;  %s629_s12 = int_to_ptr.vmem [resolvable:$true] %s628_s12 }
  0x1d   : > { %360 = vmatpush.bf16.xpose.msra.mxu0 %v352_v6  ;;  %404 = vmatpush.bf16.msra.mxu1 %v396_v24  ;;  %v825_v42 = vld [vmem:[%s1197_s4 + $0x20] sm:$0xff]  ;;  %p920_p12 = scmp.ne.s32.totalorder %s918_s14, %s919_s24  ;;  %p924_p1 = scmp.lt.s32.totalorder %s918_s14, %s1199_s6 }
  0x1e   : > { %514 = vmatpush.bf16.msra.mxu3 %v822_v33  ;;  %477 = vmatpush.bf16.msra.mxu2 %v826_v34  ;;  %v829_v43 = vld [vmem:[%s1197_s4 + $0x40] sm:$0xff]  ;;  %p925_p2 = scmp.lt.s32.totalorder %s923_s18, %s919_s24 }
  0x1f   : > { %v833_v44 = vld [vmem:[%s1197_s4 + $0x60] sm:$0xff]  ;;  %p921_p13 = pnand %p920_p12, %p1059_p4 }
  0x20   : > { %v896_v59 = vld [vmem:[%s1198_s5] ss:$0 sm:$0xff]  ;;  %p926_p3 = por %p925_p2, %p924_p1 }
  0x21   : > { %405 = vmatpush.bf16.msra.mxu1 %v342_v7  ;;  %p922_p0 = pneg %p921_p13 }
  0x22   : > { %515 = vmatpush.bf16.msra.mxu3 %v821_v37  ;;  %478 = vmatpush.bf16.msra.mxu2 %v825_v42 }
  0x23   : > { %p927_p5 = pnand %p926_p3, %p922_p0 }
  0x25   : > { %361 = vmatpush.bf16.xpose.msra.mxu0 %v349_v8  ;;  %554 = vmatpush.bf16.msrb.mxu1 %v832_v27 }
  0x26   : > { %782 = vmatmul.msk.bf16.vlgmr.msra.gmra.mxu3 %vm344_vm0, %v341_v10 }
  0x29   : > { %555 = vmatpush.bf16.msrb.mxu1 %v831_v31 }
  0x2c   : > { %747 = vmatmul.msk.bf16.vlgmr.msra.gmra.mxu0 %vm344_vm0, %v341_v10 }
  0x2d   : > { %597 = vmatpush.bf16.msrb.mxu0 %v836_v28  ;;  %556 = vmatpush.bf16.msrb.mxu1 %v830_v35 }
  0x31   : > { %598 = vmatpush.bf16.msrb.mxu0 %v835_v32  ;;  %557 = vmatpush.bf16.msrb.mxu1 %v829_v43 }
  0x35   : > { %599 = vmatpush.bf16.msrb.mxu0 %v834_v36 }
  0x39   : > { %600 = vmatpush.bf16.msrb.mxu0 %v833_v44 }
  0x8b   : > { %v371_v12 = vpop.permute.xlu0 %370 }
  0x8c   : > { %v376_v13 = vmul.f32 %v895_v11, %v371_v12 }
  0x8e   : > { %vm377_vm1 = vcmp.gt.f32.partialorder %v376_v13, 0.0 }
  0xa9   : > { %v363_v14 = vpop.f32.mrf.mxu0  ;;  %v517_v45 = vpop.f32.mrf.mxu3 }
  0xaa   : > { %v367_v15 = vmul.f32 0.125, %v363_v14 }
  0xac   : > { %v378_v16 = vsel %vm377_vm1, %v367_v15, -1e+09 }
  0xad   : > { %v380_v17 = vsel %vm379_vm2, %v378_v16, -inf }
  0xae   : > { %381 = vmax.xlane.f32.xlu0 %v380_v17 }
  0xb1   : > { %v365_v18 = vpop.f32.mrf.mxu0  ;;  %v519_v46 = vpop.f32.mrf.mxu3 }
 0x121   : > { %v382_v19 = vpop.xlane.xlu0 %381 }
 0x122   : > { %v383_v20 = vsub.f32 %v378_v16, %v382_v19 }
 0x124   : > { %v384_v21 = vmul.f32 1.442695, %v383_v20 }
 0x126   : > { %897 = vpow2.f32 %v384_v21 }
 0x12c   : > { %v898_v22 = vpop.eup %897 }
 0x12d   : > { %v386_v23 = vsel %vm379_vm2, %v898_v22, 0.0 }
 0x12e   : > { %387 = vadd.xlane.f32.xlu1 %v386_v23 }
 0x1a1   : > { %v388_v38 = vpop.xlane.xlu1 %387 }
 0x1a2   : > { %899 = vrcp.f32 %v388_v38 }
 0x1a8   : > { %v900_v39 = vpop.eup %899 }
 0x1a9   : > { %v390_v40 = vmul.f32 %v900_v39, %v898_v22 }
 0x1ab   : > { %v391_v41 = vpack.c.bf16 %v390_v40, %v390_v40 }
 0x1ad   : > { %748 = vmatmul.msk.bf16.vlgmr.msra.gmra.mxu1 %vm379_vm2, %v391_v41 }
 0x22a   : > { %v407_v47 = vpop.f32.mrf.mxu1 }
 0x22b   : > { %v443_v48 = vpack.c.bf16 %v407_v47, %v407_v47  ;;  %v521_v49 = vmul.f32 %v407_v47, %v1090_v9  ;;  %v564_v50 = vsub.f32 %v1090_v9, %v407_v47 }
 0x22d   : > { %v522_v51 = vpack.c.bf16 %v521_v49, %v521_v49  ;;  %v565_v52 = vpack.c.bf16 %v564_v50, %v564_v50  ;;  %765 = vmatmul.msk.bf16.vlgmr.msra.gmra.mxu2 %vm344_vm0, %v443_v48 }
 0x22f   : > { %799 = vmatmul.msk.bf16.vlgmr.msrb.gmra.mxu1 %vm344_vm0, %v522_v51  ;;  %816 = vmatmul.msk.bf16.vlgmr.msrb.gmra.mxu0 %vm344_vm0, %v565_v52 }
 0x232   : > { %v409_v53 = vpop.f32.mrf.mxu1 }
 0x2ac   : > { %v559_v54 = vpop.f32.mrf.mxu1  ;;  %v602_v55 = vpop.f32.mrf.mxu0 }
 0x2b0   : > { %v480_v56 = vpop.f32.mrf.mxu2 }
 0x2b1   : > { %v518_v57 = vadd.f32 %v517_v45, %v480_v56 }
 0x2b3   : > { %v563_v58 = vadd.f32 %v559_v54, %v518_v57 }
 0x2b4   : > { %v561_v60 = vpop.f32.mrf.mxu1  ;;  %v604_v61 = vpop.f32.mrf.mxu0 }
 0x2b5   : > { %v606_v62 = vadd.f32 %v602_v55, %v563_v58 }
 0x2b7   : > { %v611_v63 = vadd.f32 %v896_v59, %v606_v62 }
 0x2b8   : > { %v482_v0 = vpop.f32.mrf.mxu2 }
 0x2b9   : > { %901 = vtanh.f32 %v611_v63 }
 0x2bf   : > { %v902_v1 = vpop.eup %901 }
 0x2c0   : > { %613 = vst.msk [vmem:[%s311_s8] sm:$0xff] %vm344_vm0, %v902_v1 }
 0x2c1   : > { %930 = shalt.err (!%p927_p5)
}
 0x2c2   : > { %838 = dma.vmem_to_hbm [thread:$0]  (%p1059_p4), %s629_s12, 128, %s631_s11, %s615_s13  }
 0x2c3 PF: > { %p844_p6 = scmp.ge.s32.totalorder %s981_s26, 2  ;;  %s642_s16 = sand.u32 1, %s961_s21  }
 0x2c4   : > { %s643_s27 = scalar_lea.sflag [#allocation3], %s642_s16 }
 0x2c5   : > { %p841_p7 = pnand %p844_p6, %p1066_p8 }
 0x2c7   : > { %p842_p9 = pneg %p841_p7 }
 0x2c9   : > { %956 = dma.done.wait (%p842_p9), %s643_s27, 128  }
 0x2ca   : > { %958 = vsyncadd (%p842_p9), %s643_s27, 4294967168  ;;  %s19_s26 = sadd.s32 1, %s981_s26   ;;  %s1202_s21 = smov %s965_s22 }
 0x2cb   : > { %p16_p10 = scmp.ge.s32.totalorder %s19_s26, 4   ;;  %s1203_s22 = smov %s969_s23 }
 0x2cc   : > { %s1204_s23 = smov %s1072_s10  ;;  %s1205_s24 = smov %s977_s25 }
 0x2cd   : > { %s1206_s25 = smov %s1208_s29  ;;  %18 = sbr.rel (!%p16_p10) target bundleno = 4 (0x4), region = 88 }
 0x2d2   :  { %649 = vsyncpa [#allocation3], 1 }
 0x2d3   :  { %651 = vsyncpa [#allocation3 + $0x1], 1 }

</bundles_post_ra>
